<compile_context>
chip_gen: v7x
topology: tpu7x:2x2x1
jax: 0.10.0
libtpu: 0.0.40
codegen_flags: <defaults>
</compile_context>

<pallas_src>
import jax
import jax.numpy as jnp
from jax import lax
from jax.experimental import pallas as pl
from jax.experimental.pallas import tpu as pltpu


def lstm_block_kernel(x_ref, wih_hbm, whh_hbm, b_hbm, wlin_hbm, blin_hbm,
                      y_ref,
                      wih_v, whh_v, b_v, wlin_v, blin_v,
                      h_scr, c_scr, gx_scr, hs_scr):
    # x_ref   : (t_blk*Bc, I8)   compute dtype, rows ordered (t, b) time-major
    # y_ref   : (t_blk*Bc, Op)   f32
    # *_hbm   : weight operands left in place (pl.ANY); copied once to VMEM
    # *_v     : single-buffered VMEM copies of the weights / biases
    # h_scr/c_scr : (Bc, Hp)     f32 recurrent carry (persists across grid)
    # gx_scr  : (t_blk*Bc, 4Hp)  precomputed input-gate contributions
    # hs_scr  : (t_blk*Bc, Hp)   f32 hidden states for the block
    t_idx = pl.program_id(1)

    @pl.when(t_idx == 0)
    def _init():
        # Single-buffered weight residency (vs. default double-buffered
        # BlockSpec path).  Keyed on the time index so it also runs on the
        # core that owns the later batch chunks under megacore partitioning.
        # TODO(synk): skip the redundant re-copy on later batch chunks of the
        # same core (needs a persistent "loaded" flag); negligible unless
        # batch_chunks * weight_bytes is large.
        pltpu.sync_copy(wih_hbm, wih_v)
        pltpu.sync_copy(whh_hbm, whh_v)
        pltpu.sync_copy(b_hbm, b_v)
        pltpu.sync_copy(wlin_hbm, wlin_v)
        pltpu.sync_copy(blin_hbm, blin_v)
        # Fresh recurrent state for this batch chunk.
        h_scr[...] = jnp.zeros_like(h_scr)
        c_scr[...] = jnp.zeros_like(c_scr)

    Bc, Hp = h_scr.shape
    t_blk = hs_scr.shape[0] // Bc
    cdt = wih_v.dtype                        # matmul compute dtype

    # (1) Input projection for the whole block, hoisted out of the recurrence:
    #     (t_blk*Bc, I8) @ (I8, 4*Hp) + bias.  Bias added once here.
    gx_scr[...] = (
        jnp.dot(x_ref[...], wih_v[...], preferred_element_type=jnp.float32)
        + b_v[...]).astype(gx_scr.dtype)

    def sigmoid1(z):
        # One EUP push (tanh) per gate instead of exp + reciprocal.
        return 0.5 * jnp.tanh(0.5 * z) + 0.5

    # (2) Sequential recurrence over the block's timesteps.  Only the small
    #     h @ W_hh^T matmul and elementwise gate math stay on the serial path.
    # TODO(synk): W_hh^T is re-loaded into the MXU every step (M = Bc = 8); a
    # weight-stationary pltpu.matmul_push_rhs / matmul_acc_lhs / matmul_pop
    # sequence would remove most of the per-step MXU time when Hp*4Hp fits the
    # staging registers.  Likewise, chunk the gate math along Hp for very
    # large hidden sizes to bound vreg pressure.
    def step(i, carry):
        h, c = carry                          # (Bc, Hp) f32
        off = pl.multiple_of(i * Bc, Bc)
        gates = gx_scr[pl.ds(off, Bc), :].astype(jnp.float32) + jnp.dot(
            h.astype(cdt), whh_v[...], preferred_element_type=jnp.float32)
        # Lane-aligned gate slices (Hp is a multiple of 128).
        i_g = sigmoid1(gates[:, 0 * Hp:1 * Hp])
        f_g = sigmoid1(gates[:, 1 * Hp:2 * Hp])
        g_g = jnp.tanh(gates[:, 2 * Hp:3 * Hp])
        o_g = sigmoid1(gates[:, 3 * Hp:4 * Hp])
        c = f_g * c + i_g * g_g
        h = o_g * jnp.tanh(c)
        # f32 store, (8,128)-aligned -> unmasked vst (no bf16 half-tile RMW).
        hs_scr[pl.ds(off, Bc), :] = h
        return h, c

    h, c = lax.fori_loop(0, t_blk, step, (h_scr[...], c_scr[...]),
                         unroll=min(t_blk, 8))
    h_scr[...] = h
    c_scr[...] = c

    # (3) Fused Linear once per block: (t_blk*Bc, Hp) @ (Hp, Op) + b, one
    #     lane-dense store of the whole output slab.
    y_ref[...] = (
        jnp.dot(hs_scr[...].astype(cdt), wlin_v[...],
                preferred_element_type=jnp.float32)
        + blin_v[...]).astype(y_ref.dtype)


def _round_up(n, m):
    return ((n + m - 1) // m) * m


def _pick_t_blk(s, max_blk=64):
    t = 1
    for d in range(1, min(s, max_blk) + 1):
        if s % d == 0:
            t = d
    return t


def pack_lstm_params(w_ih, w_hh, b_ih, b_hh, w_lin, b_lin, *,
                     compute_dtype=jnp.bfloat16):
    """One-time repack of PyTorch-layout LSTM + Linear params.

    w_ih: (4H, I), w_hh: (4H, H), b_ih/b_hh: (4H,)   gate order [i, f, g, o]
    w_lin: (O, H), b_lin: (O,)
    Gates are transposed and padded per-gate to Hp = round_up(H, 128) lanes;
    the input feature dim is only padded to a sublane multiple of 8.
    """
    H = w_hh.shape[1]
    I = w_ih.shape[1]
    O = w_lin.shape[0]
    I8 = _round_up(I, 8)
    Hp = _round_up(H, 128)
    Op = _round_up(O, 128)
    f32 = jnp.float32

    def pack_gates(w, in_dim, in_p):
        out = jnp.zeros((in_p, 4 * Hp), f32)
        for k in range(4):
            out = out.at[:in_dim, k * Hp:k * Hp + H].set(
                w[k * H:(k + 1) * H, :].T.astype(f32))
        return out

    wih_p = pack_gates(w_ih, I, I8).astype(compute_dtype)      # (I8, 4Hp)
    whh_p = pack_gates(w_hh, H, Hp).astype(compute_dtype)      # (Hp, 4Hp)

    bias = (b_ih + b_hh).astype(f32)
    b_p = jnp.zeros((1, 4 * Hp), f32)
    for k in range(4):
        b_p = b_p.at[0, k * Hp:k * Hp + H].set(bias[k * H:(k + 1) * H])

    wlin_p = jnp.zeros((Hp, Op), f32).at[:H, :O].set(
        w_lin.T.astype(f32)).astype(compute_dtype)
    blin_p = jnp.zeros((1, Op), f32).at[0, :O].set(b_lin.astype(f32))

    return dict(wih=wih_p, whh=whh_p, b=b_p, wlin=wlin_p, blin=blin_p,
                dims=dict(I=I, H=H, O=O, I8=I8, Hp=Hp, Op=Op),
                compute_dtype=compute_dtype)


def lstm_forward(x, params, *, t_blk=None, b_chunk=8, gx_dtype=jnp.float32):
    """Single-layer LSTM + fused output Linear.

    x: (S, B, I) float32; params from pack_lstm_params.
    returns (S, B, O) float32.

    gx_dtype: keep f32 by default; set to bf16 on v7x/v5e to halve the gx
    slab's VMEM footprint / store traffic (error stays at bf16-matmul level).
    """
    S, B, I = x.shape
    d = params["dims"]
    I8, Hp, Op, O = d["I8"], d["Hp"], d["Op"], d["O"]
    assert I == d["I"]
    cdt = params["compute_dtype"]

    assert b_chunk % 8 == 0
    Bc = b_chunk
    Bp = _round_up(max(B, Bc), Bc)
    NB = Bp // Bc                                  # batch chunks ("parallel")
    if t_blk is None:
        t_blk = _pick_t_blk(S)
    assert S % t_blk == 0
    rows_blk = t_blk * Bc

    # --- pad batch / input-feature (sublane only) and lay out per chunk -----
    x_p = jnp.zeros((S, Bp, I8), jnp.float32).at[:, :B, :I].set(
        x.astype(jnp.float32))
    x_p = (x_p.reshape(S, NB, Bc, I8).transpose(1, 0, 2, 3)
           .reshape(NB, S * Bc, I8).astype(cdt))

    # --- explicit VMEM budget (weights single-buffered, x/y double) ---------
    isz = jnp.dtype(cdt).itemsize
    gsz = jnp.dtype(gx_dtype).itemsize
    vmem_bytes = (
        2 * rows_blk * I8 * isz                       # x block (double-buf)
        + 2 * rows_blk * Op * 4                       # y block (double-buf)
        + (I8 * 4 * Hp + Hp * 4 * Hp + Hp * Op) * isz  # resident weights
        + (4 * Hp + Op) * 4                           # resident biases (f32)
        + rows_blk * 4 * Hp * gsz                     # gx slab
        + rows_blk * Hp * 4                           # hidden slab (f32)
        + 2 * Bc * Hp * 4)                            # h/c carries
    vmem_limit = int(min(max(2 * vmem_bytes, 32 * 1024 * 1024),
                         100 * 1024 * 1024))

    grid = (NB, S // t_blk)

    y = pl.pallas_call(
        lstm_block_kernel,
        out_shape=jax.ShapeDtypeStruct((NB, S * Bc, Op), jnp.float32),
        grid_spec=pltpu.PrefetchScalarGridSpec(
            num_scalar_prefetch=0,
            grid=grid,
            in_specs=[
                pl.BlockSpec((None, rows_blk, I8), lambda b, t: (b, t, 0)),
                # Constant weights: leave in place, copy once to VMEM scratch
                # inside the kernel (single-buffered residency).
                pl.BlockSpec(memory_space=pl.ANY),     # W_ih^T
                pl.BlockSpec(memory_space=pl.ANY),     # W_hh^T
                pl.BlockSpec(memory_space=pl.ANY),     # bias
                pl.BlockSpec(memory_space=pl.ANY),     # W_lin^T
                pl.BlockSpec(memory_space=pl.ANY),     # b_lin
            ],
            out_specs=pl.BlockSpec((None, rows_blk, Op),
                                   lambda b, t: (b, t, 0)),
            scratch_shapes=[
                pltpu.VMEM((I8, 4 * Hp), cdt),             # W_ih^T resident
                pltpu.VMEM((Hp, 4 * Hp), cdt),             # W_hh^T resident
                pltpu.VMEM((1, 4 * Hp), jnp.float32),      # bias resident
                pltpu.VMEM((Hp, Op), cdt),                 # W_lin^T resident
                pltpu.VMEM((1, Op), jnp.float32),          # b_lin resident
                pltpu.VMEM((Bc, Hp), jnp.float32),         # h carry
                pltpu.VMEM((Bc, Hp), jnp.float32),         # c carry
                pltpu.VMEM((rows_blk, 4 * Hp), gx_dtype),  # gx block
                pltpu.VMEM((rows_blk, Hp), jnp.float32),   # hidden slab (f32)
            ],
        ),
        compiler_params=pltpu.CompilerParams(
            # batch chunks independent -> parallel (megacore / v7x 2 TCs);
            # time recurrence serial -> arbitrary.
            dimension_semantics=("parallel", "arbitrary"),
            vmem_limit_bytes=vmem_limit),
    )(x_p, params["wih"], params["whh"], params["b"],
      params["wlin"], params["blin"])

    y = (y.reshape(NB, S, Bc, Op).transpose(1, 0, 2, 3)
         .reshape(S, Bp, Op))
    return y[:, :B, :O]


def lstm_reference(x, w_ih, w_hh, b_ih, b_hh, w_lin, b_lin):
    """Pure-JAX f32 reference matching PyTorch nn.LSTM + nn.Linear."""
    S, B, I = x.shape
    H = w_hh.shape[1]
    wih_t = w_ih.T
    whh_t = w_hh.T
    bias = (b_ih + b_hh)[None, :]

    def step(carry, x_t):
        h, c = carry
        gates = x_t @ wih_t + h @ whh_t + bias
        i = jax.nn.sigmoid(gates[:, 0 * H:1 * H])
        f = jax.nn.sigmoid(gates[:, 1 * H:2 * H])
        g = jnp.tanh(gates[:, 2 * H:3 * H])
        o = jax.nn.sigmoid(gates[:, 3 * H:4 * H])
        c = f * c + i * g
        h = o * jnp.tanh(c)
        return (h, c), h

    h0 = jnp.zeros((B, H), jnp.float32)
    c0 = jnp.zeros((B, H), jnp.float32)
    _, hs = lax.scan(step, (h0, c0), x)                   # (S, B, H)
    y = hs.reshape(S * B, H) @ w_lin.T + b_lin[None, :]
    return y.reshape(S, B, -1)


if __name__ == "__main__":
    SEQ, BATCH = 8, 4
    INPUT_SIZE, HIDDEN_SIZE, OUTPUT_SIZE = 16, 32, 8

    key = jax.random.PRNGKey(0)
    ks = jax.random.split(key, 7)

    # Deterministic synthetic parameters (PyTorch-style small uniform init).
    scale = 1.0 / (HIDDEN_SIZE ** 0.5)
    w_ih = jax.random.uniform(ks[0], (4 * HIDDEN_SIZE, INPUT_SIZE),
                              minval=-scale, maxval=scale, dtype=jnp.float32)
    w_hh = jax.random.uniform(ks[1], (4 * HIDDEN_SIZE, HIDDEN_SIZE),
                              minval=-scale, maxval=scale, dtype=jnp.float32)
    b_ih = jax.random.uniform(ks[2], (4 * HIDDEN_SIZE,),
                              minval=-scale, maxval=scale, dtype=jnp.float32)
    b_hh = jax.random.uniform(ks[3], (4 * HIDDEN_SIZE,),
                              minval=-scale, maxval=scale, dtype=jnp.float32)
    w_lin = jax.random.uniform(ks[4], (OUTPUT_SIZE, HIDDEN_SIZE),
                               minval=-scale, maxval=scale, dtype=jnp.float32)
    b_lin = jax.random.uniform(ks[5], (OUTPUT_SIZE,),
                               minval=-scale, maxval=scale, dtype=jnp.float32)
    x = jax.random.normal(ks[6], (SEQ, BATCH, INPUT_SIZE), jnp.float32)

    y_ref = lstm_reference(x, w_ih, w_hh, b_ih, b_hh, w_lin, b_lin)

    # f32 compute path: tight check against the pure-JAX reference.
    params_f32 = pack_lstm_params(w_ih, w_hh, b_ih, b_hh, w_lin, b_lin,
                                  compute_dtype=jnp.float32)
    y_f32 = jax.block_until_ready(lstm_forward(x, params_f32))
    assert y_f32.shape == (SEQ, BATCH, OUTPUT_SIZE)
    err_f32 = float(jnp.max(jnp.abs(y_f32 - y_ref)))
    assert jnp.allclose(y_f32, y_ref, atol=1e-4, rtol=1e-4), err_f32

    # bf16 matmul-operand path (perf mode for v6e/v7x): looser tolerance.
    # NOTE: bf16 rounding of h compounds with sequence length; re-validate the
    # tolerance at production S before shipping the bf16 path.
    params_bf16 = pack_lstm_params(w_ih, w_hh, b_ih, b_hh, w_lin, b_lin,
                                   compute_dtype=jnp.bfloat16)
    y_bf16 = jax.block_until_ready(lstm_forward(x, params_bf16))
    assert y_bf16.shape == (SEQ, BATCH, OUTPUT_SIZE)
    err_bf16 = float(jnp.max(jnp.abs(y_bf16 - y_ref)))
    assert jnp.allclose(y_bf16, y_ref, atol=7.5e-2, rtol=7.5e-2), err_bf16

    print("KERNEL_OK")
</pallas_src>

<mosaic_0001>
module attributes {stable_mosaic.version = 11 : i64} {
  func.func @lstm_block_kernel(%arg0: i32, %arg1: i32, %arg2: memref<1x64x16xf32, #tpu.memory_space<vmem>>, %arg3: memref<16x512xf32, #tpu.memory_space<any>>, %arg4: memref<128x512xf32, #tpu.memory_space<any>>, %arg5: memref<1x512xf32, #tpu.memory_space<any>>, %arg6: memref<128x128xf32, #tpu.memory_space<any>>, %arg7: memref<1x128xf32, #tpu.memory_space<any>>, %arg8: memref<1x64x128xf32, #tpu.memory_space<vmem>>, %arg9: memref<16x512xf32, #tpu.memory_space<vmem>>, %arg10: memref<128x512xf32, #tpu.memory_space<vmem>>, %arg11: memref<1x512xf32, #tpu.memory_space<vmem>>, %arg12: memref<128x128xf32, #tpu.memory_space<vmem>>, %arg13: memref<1x128xf32, #tpu.memory_space<vmem>>, %arg14: memref<8x128xf32, #tpu.memory_space<vmem>>, %arg15: memref<8x128xf32, #tpu.memory_space<vmem>>, %arg16: memref<64x512xf32, #tpu.memory_space<vmem>>, %arg17: memref<64x128xf32, #tpu.memory_space<vmem>>) attributes {dimension_semantics = [#tpu.dimension_semantics<parallel>, #tpu.dimension_semantics<arbitrary>], iteration_bounds = array<i64: 1, 1>, scalar_prefetch = 0 : i64, scratch_operands = 9 : i64, tpu.core_type = #tpu.core_type<tc>, window_params = [{transform_indices = @transform_0, window_bounds = array<i64: 1, 64, 16>}, {}, {}, {}, {}, {}, {transform_indices = @transform_6, window_bounds = array<i64: 1, 64, 128>}]} {
    %c0_i32 = arith.constant 0 : i32
    %0 = arith.cmpi eq, %arg1, %c0_i32 : i32
    %1 = arith.extui %0 : i1 to i32
    %c0_i32_0 = arith.constant 0 : i32
    %2 = arith.cmpi ne, %1, %c0_i32_0 : i32
    scf.if %2 {
      "tpu.region"() ({
        %348 = tpu.sem_alloc : memref<!tpu.dma_semaphore, #tpu.memory_space<semaphore_mem>>
        tpu.enqueue_dma source(%arg3 : memref<16x512xf32, #tpu.memory_space<any>>) target(%arg9 : memref<16x512xf32, #tpu.memory_space<vmem>>) target_semaphore(%348 : memref<!tpu.dma_semaphore, #tpu.memory_space<semaphore_mem>>)
        tpu.wait_dma2 semaphore(%348 : memref<!tpu.dma_semaphore, #tpu.memory_space<semaphore_mem>>) src(%arg3 : memref<16x512xf32, #tpu.memory_space<any>>) dst(%arg9 : memref<16x512xf32, #tpu.memory_space<vmem>>)
        tpu.yield
      }) : () -> ()
      "tpu.region"() ({
        %348 = tpu.sem_alloc : memref<!tpu.dma_semaphore, #tpu.memory_space<semaphore_mem>>
        tpu.enqueue_dma source(%arg4 : memref<128x512xf32, #tpu.memory_space<any>>) target(%arg10 : memref<128x512xf32, #tpu.memory_space<vmem>>) target_semaphore(%348 : memref<!tpu.dma_semaphore, #tpu.memory_space<semaphore_mem>>)
        tpu.wait_dma2 semaphore(%348 : memref<!tpu.dma_semaphore, #tpu.memory_space<semaphore_mem>>) src(%arg4 : memref<128x512xf32, #tpu.memory_space<any>>) dst(%arg10 : memref<128x512xf32, #tpu.memory_space<vmem>>)
        tpu.yield
      }) : () -> ()
      "tpu.region"() ({
        %348 = tpu.sem_alloc : memref<!tpu.dma_semaphore, #tpu.memory_space<semaphore_mem>>
        tpu.enqueue_dma source(%arg5 : memref<1x512xf32, #tpu.memory_space<any>>) target(%arg11 : memref<1x512xf32, #tpu.memory_space<vmem>>) target_semaphore(%348 : memref<!tpu.dma_semaphore, #tpu.memory_space<semaphore_mem>>)
        tpu.wait_dma2 semaphore(%348 : memref<!tpu.dma_semaphore, #tpu.memory_space<semaphore_mem>>) src(%arg5 : memref<1x512xf32, #tpu.memory_space<any>>) dst(%arg11 : memref<1x512xf32, #tpu.memory_space<vmem>>)
        tpu.yield
      }) : () -> ()
      "tpu.region"() ({
        %348 = tpu.sem_alloc : memref<!tpu.dma_semaphore, #tpu.memory_space<semaphore_mem>>
        tpu.enqueue_dma source(%arg6 : memref<128x128xf32, #tpu.memory_space<any>>) target(%arg12 : memref<128x128xf32, #tpu.memory_space<vmem>>) target_semaphore(%348 : memref<!tpu.dma_semaphore, #tpu.memory_space<semaphore_mem>>)
        tpu.wait_dma2 semaphore(%348 : memref<!tpu.dma_semaphore, #tpu.memory_space<semaphore_mem>>) src(%arg6 : memref<128x128xf32, #tpu.memory_space<any>>) dst(%arg12 : memref<128x128xf32, #tpu.memory_space<vmem>>)
        tpu.yield
      }) : () -> ()
      "tpu.region"() ({
        %348 = tpu.sem_alloc : memref<!tpu.dma_semaphore, #tpu.memory_space<semaphore_mem>>
        tpu.enqueue_dma source(%arg7 : memref<1x128xf32, #tpu.memory_space<any>>) target(%arg13 : memref<1x128xf32, #tpu.memory_space<vmem>>) target_semaphore(%348 : memref<!tpu.dma_semaphore, #tpu.memory_space<semaphore_mem>>)
        tpu.wait_dma2 semaphore(%348 : memref<!tpu.dma_semaphore, #tpu.memory_space<semaphore_mem>>) src(%arg7 : memref<1x128xf32, #tpu.memory_space<any>>) dst(%arg13 : memref<1x128xf32, #tpu.memory_space<vmem>>)
        tpu.yield
      }) : () -> ()
      %cst_148 = arith.constant 0.000000e+00 : f32
      %344 = vector.broadcast %cst_148 : f32 to vector<8x128xf32>
      %c0_149 = arith.constant 0 : index
      %c0_150 = arith.constant 0 : index
      %345 = vector.load %arg14[%c0_149, %c0_150] : memref<8x128xf32, #tpu.memory_space<vmem>>, vector<8x128xf32>
      tpu.vector_store %arg14[%c0_149, %c0_150], %344 {strides = array<i32>} : memref<8x128xf32, #tpu.memory_space<vmem>>, vector<8x128xf32>,
      %cst_151 = arith.constant 0.000000e+00 : f32
      %346 = vector.broadcast %cst_151 : f32 to vector<8x128xf32>
      %c0_152 = arith.constant 0 : index
      %c0_153 = arith.constant 0 : index
      %347 = vector.load %arg15[%c0_152, %c0_153] : memref<8x128xf32, #tpu.memory_space<vmem>>, vector<8x128xf32>
      tpu.vector_store %arg15[%c0_152, %c0_153], %346 {strides = array<i32>} : memref<8x128xf32, #tpu.memory_space<vmem>>, vector<8x128xf32>,
    } else {
    }
    %c0 = arith.constant 0 : index
    %c0_1 = arith.constant 0 : index
    %c0_2 = arith.constant 0 : index
    %3 = vector.load %arg2[%c0, %c0_1, %c0_2] : memref<1x64x16xf32, #tpu.memory_space<vmem>>, vector<1x64x16xf32>
    %4 = vector.shape_cast %3 : vector<1x64x16xf32> to vector<64x16xf32>
    %c0_3 = arith.constant 0 : index
    %c0_4 = arith.constant 0 : index
    %5 = vector.load %arg9[%c0_3, %c0_4] : memref<16x512xf32, #tpu.memory_space<vmem>>, vector<16x512xf32>
    %cst = arith.constant dense<0.000000e+00> : vector<64x512xf32>
    %6 = tpu.matmul %4, %5, %cst {dimension_numbers = #tpu.dot_dimension_numbers<[1], [0], [0], [1], [0, 0, 1, 1], [], []>} : vector<64x16xf32>, vector<16x512xf32>, vector<64x512xf32> -> vector<64x512xf32>
    %c0_5 = arith.constant 0 : index
    %c0_6 = arith.constant 0 : index
    %7 = vector.load %arg11[%c0_5, %c0_6] : memref<1x512xf32, #tpu.memory_space<vmem>>, vector<1x512xf32>
    %8 = vector.broadcast %7 : vector<1x512xf32> to vector<64x512xf32>
    %9 = arith.addf %6, %8 : vector<64x512xf32>
    %c0_7 = arith.constant 0 : index
    %c0_8 = arith.constant 0 : index
    %10 = vector.load %arg16[%c0_7, %c0_8] : memref<64x512xf32, #tpu.memory_space<vmem>>, vector<64x512xf32>
    tpu.vector_store %arg16[%c0_7, %c0_8], %9 {strides = array<i32>} : memref<64x512xf32, #tpu.memory_space<vmem>>, vector<64x512xf32>,
    %c0_9 = arith.constant 0 : index
    %c0_10 = arith.constant 0 : index
    %11 = vector.load %arg14[%c0_9, %c0_10] : memref<8x128xf32, #tpu.memory_space<vmem>>, vector<8x128xf32>
    %c0_11 = arith.constant 0 : index
    %c0_12 = arith.constant 0 : index
    %12 = vector.load %arg15[%c0_11, %c0_12] : memref<8x128xf32, #tpu.memory_space<vmem>>, vector<8x128xf32>
    %c0_i32_13 = arith.constant 0 : i32
    %c8_i32 = arith.constant 8 : i32
    %13 = arith.muli %c0_i32_13, %c8_i32 : i32
    %14 = tpu.assume_multiple %13, 8 : i32
    %15 = arith.index_cast %14 : i32 to index
    %c0_14 = arith.constant 0 : index
    %16 = vector.load %arg16[%15, %c0_14] : memref<64x512xf32, #tpu.memory_space<vmem>>, vector<8x512xf32>
    %c0_15 = arith.constant 0 : index
    %c0_16 = arith.constant 0 : index
    %17 = vector.load %arg10[%c0_15, %c0_16] : memref<128x512xf32, #tpu.memory_space<vmem>>, vector<128x512xf32>
    %cst_17 = arith.constant dense<0.000000e+00> : vector<8x512xf32>
    %18 = tpu.matmul %11, %17, %cst_17 {dimension_numbers = #tpu.dot_dimension_numbers<[1], [0], [0], [1], [0, 0, 1, 1], [], []>} : vector<8x128xf32>, vector<128x512xf32>, vector<8x512xf32> -> vector<8x512xf32>
    %19 = arith.addf %16, %18 : vector<8x512xf32>
    %20 = vector.extract_strided_slice %19 {offsets = [0, 0], sizes = [8, 128], strides = [1, 1]} : vector<8x512xf32> to vector<8x128xf32>
    %cst_18 = arith.constant 5.000000e-01 : f32
    %21 = vector.broadcast %cst_18 : f32 to vector<8x128xf32>
    %22 = arith.mulf %21, %20 : vector<8x128xf32>
    %23 = math.tanh %22 : vector<8x128xf32>
    %cst_19 = arith.constant 5.000000e-01 : f32
    %24 = vector.broadcast %cst_19 : f32 to vector<8x128xf32>
    %25 = arith.mulf %24, %23 : vector<8x128xf32>
    %cst_20 = arith.constant 5.000000e-01 : f32
    %26 = vector.broadcast %cst_20 : f32 to vector<8x128xf32>
    %27 = arith.addf %25, %26 : vector<8x128xf32>
    %28 = vector.extract_strided_slice %19 {offsets = [0, 128], sizes = [8, 128], strides = [1, 1]} : vector<8x512xf32> to vector<8x128xf32>
    %cst_21 = arith.constant 5.000000e-01 : f32
    %29 = vector.broadcast %cst_21 : f32 to vector<8x128xf32>
    %30 = arith.mulf %29, %28 : vector<8x128xf32>
    %31 = math.tanh %30 : vector<8x128xf32>
    %cst_22 = arith.constant 5.000000e-01 : f32
    %32 = vector.broadcast %cst_22 : f32 to vector<8x128xf32>
    %33 = arith.mulf %32, %31 : vector<8x128xf32>
    %cst_23 = arith.constant 5.000000e-01 : f32
    %34 = vector.broadcast %cst_23 : f32 to vector<8x128xf32>
    %35 = arith.addf %33, %34 : vector<8x128xf32>
    %36 = vector.extract_strided_slice %19 {offsets = [0, 256], sizes = [8, 128], strides = [1, 1]} : vector<8x512xf32> to vector<8x128xf32>
    %37 = math.tanh %36 : vector<8x128xf32>
    %38 = vector.extract_strided_slice %19 {offsets = [0, 384], sizes = [8, 128], strides = [1, 1]} : vector<8x512xf32> to vector<8x128xf32>
    %cst_24 = arith.constant 5.000000e-01 : f32
    %39 = vector.broadcast %cst_24 : f32 to vector<8x128xf32>
    %40 = arith.mulf %39, %38 : vector<8x128xf32>
    %41 = math.tanh %40 : vector<8x128xf32>
    %cst_25 = arith.constant 5.000000e-01 : f32
    %42 = vector.broadcast %cst_25 : f32 to vector<8x128xf32>
    %43 = arith.mulf %42, %41 : vector<8x128xf32>
    %cst_26 = arith.constant 5.000000e-01 : f32
    %44 = vector.broadcast %cst_26 : f32 to vector<8x128xf32>
    %45 = arith.addf %43, %44 : vector<8x128xf32>
    %46 = arith.mulf %35, %12 : vector<8x128xf32>
    %47 = arith.mulf %27, %37 : vector<8x128xf32>
    %48 = arith.addf %46, %47 : vector<8x128xf32>
    %49 = math.tanh %48 : vector<8x128xf32>
    %50 = arith.mulf %45, %49 : vector<8x128xf32>
    %51 = arith.index_cast %14 : i32 to index
    %c0_27 = arith.constant 0 : index
    %52 = vector.load %arg17[%51, %c0_27] : memref<64x128xf32, #tpu.memory_space<vmem>>, vector<8x128xf32>
    tpu.vector_store %arg17[%51, %c0_27], %50 {strides = array<i32>} : memref<64x128xf32, #tpu.memory_space<vmem>>, vector<8x128xf32>,
    %c1_i32 = arith.constant 1 : i32
    %c8_i32_28 = arith.constant 8 : i32
    %53 = arith.muli %c1_i32, %c8_i32_28 : i32
    %54 = tpu.assume_multiple %53, 8 : i32
    %55 = arith.index_cast %54 : i32 to index
    %c0_29 = arith.constant 0 : index
    %56 = vector.load %arg16[%55, %c0_29] : memref<64x512xf32, #tpu.memory_space<vmem>>, vector<8x512xf32>
    %c0_30 = arith.constant 0 : index
    %c0_31 = arith.constant 0 : index
    %57 = vector.load %arg10[%c0_30, %c0_31] : memref<128x512xf32, #tpu.memory_space<vmem>>, vector<128x512xf32>
    %cst_32 = arith.constant dense<0.000000e+00> : vector<8x512xf32>
    %58 = tpu.matmul %50, %57, %cst_32 {dimension_numbers = #tpu.dot_dimension_numbers<[1], [0], [0], [1], [0, 0, 1, 1], [], []>} : vector<8x128xf32>, vector<128x512xf32>, vector<8x512xf32> -> vector<8x512xf32>
    %59 = arith.addf %56, %58 : vector<8x512xf32>
    %60 = vector.extract_strided_slice %59 {offsets = [0, 0], sizes = [8, 128], strides = [1, 1]} : vector<8x512xf32> to vector<8x128xf32>
    %cst_33 = arith.constant 5.000000e-01 : f32
    %61 = vector.broadcast %cst_33 : f32 to vector<8x128xf32>
    %62 = arith.mulf %61, %60 : vector<8x128xf32>
    %63 = math.tanh %62 : vector<8x128xf32>
    %cst_34 = arith.constant 5.000000e-01 : f32
    %64 = vector.broadcast %cst_34 : f32 to vector<8x128xf32>
    %65 = arith.mulf %64, %63 : vector<8x128xf32>
    %cst_35 = arith.constant 5.000000e-01 : f32
    %66 = vector.broadcast %cst_35 : f32 to vector<8x128xf32>
    %67 = arith.addf %65, %66 : vector<8x128xf32>
    %68 = vector.extract_strided_slice %59 {offsets = [0, 128], sizes = [8, 128], strides = [1, 1]} : vector<8x512xf32> to vector<8x128xf32>
    %cst_36 = arith.constant 5.000000e-01 : f32
    %69 = vector.broadcast %cst_36 : f32 to vector<8x128xf32>
    %70 = arith.mulf %69, %68 : vector<8x128xf32>
    %71 = math.tanh %70 : vector<8x128xf32>
    %cst_37 = arith.constant 5.000000e-01 : f32
    %72 = vector.broadcast %cst_37 : f32 to vector<8x128xf32>
    %73 = arith.mulf %72, %71 : vector<8x128xf32>
    %cst_38 = arith.constant 5.000000e-01 : f32
    %74 = vector.broadcast %cst_38 : f32 to vector<8x128xf32>
    %75 = arith.addf %73, %74 : vector<8x128xf32>
    %76 = vector.extract_strided_slice %59 {offsets = [0, 256], sizes = [8, 128], strides = [1, 1]} : vector<8x512xf32> to vector<8x128xf32>
    %77 = math.tanh %76 : vector<8x128xf32>
    %78 = vector.extract_strided_slice %59 {offsets = [0, 384], sizes = [8, 128], strides = [1, 1]} : vector<8x512xf32> to vector<8x128xf32>
    %cst_39 = arith.constant 5.000000e-01 : f32
    %79 = vector.broadcast %cst_39 : f32 to vector<8x128xf32>
    %80 = arith.mulf %79, %78 : vector<8x128xf32>
    %81 = math.tanh %80 : vector<8x128xf32>
    %cst_40 = arith.constant 5.000000e-01 : f32
    %82 = vector.broadcast %cst_40 : f32 to vector<8x128xf32>
    %83 = arith.mulf %82, %81 : vector<8x128xf32>
    %cst_41 = arith.constant 5.000000e-01 : f32
    %84 = vector.broadcast %cst_41 : f32 to vector<8x128xf32>
    %85 = arith.addf %83, %84 : vector<8x128xf32>
    %86 = arith.mulf %75, %48 : vector<8x128xf32>
    %87 = arith.mulf %67, %77 : vector<8x128xf32>
    %88 = arith.addf %86, %87 : vector<8x128xf32>
    %89 = math.tanh %88 : vector<8x128xf32>
    %90 = arith.mulf %85, %89 : vector<8x128xf32>
    %91 = arith.index_cast %54 : i32 to index
    %c0_42 = arith.constant 0 : index
    %92 = vector.load %arg17[%91, %c0_42] : memref<64x128xf32, #tpu.memory_space<vmem>>, vector<8x128xf32>
    tpu.vector_store %arg17[%91, %c0_42], %90 {strides = array<i32>} : memref<64x128xf32, #tpu.memory_space<vmem>>, vector<8x128xf32>,
    %c2_i32 = arith.constant 2 : i32
    %c8_i32_43 = arith.constant 8 : i32
    %93 = arith.muli %c2_i32, %c8_i32_43 : i32
    %94 = tpu.assume_multiple %93, 8 : i32
    %95 = arith.index_cast %94 : i32 to index
    %c0_44 = arith.constant 0 : index
    %96 = vector.load %arg16[%95, %c0_44] : memref<64x512xf32, #tpu.memory_space<vmem>>, vector<8x512xf32>
    %c0_45 = arith.constant 0 : index
    %c0_46 = arith.constant 0 : index
    %97 = vector.load %arg10[%c0_45, %c0_46] : memref<128x512xf32, #tpu.memory_space<vmem>>, vector<128x512xf32>
    %cst_47 = arith.constant dense<0.000000e+00> : vector<8x512xf32>
    %98 = tpu.matmul %90, %97, %cst_47 {dimension_numbers = #tpu.dot_dimension_numbers<[1], [0], [0], [1], [0, 0, 1, 1], [], []>} : vector<8x128xf32>, vector<128x512xf32>, vector<8x512xf32> -> vector<8x512xf32>
    %99 = arith.addf %96, %98 : vector<8x512xf32>
    %100 = vector.extract_strided_slice %99 {offsets = [0, 0], sizes = [8, 128], strides = [1, 1]} : vector<8x512xf32> to vector<8x128xf32>
    %cst_48 = arith.constant 5.000000e-01 : f32
    %101 = vector.broadcast %cst_48 : f32 to vector<8x128xf32>
    %102 = arith.mulf %101, %100 : vector<8x128xf32>
    %103 = math.tanh %102 : vector<8x128xf32>
    %cst_49 = arith.constant 5.000000e-01 : f32
    %104 = vector.broadcast %cst_49 : f32 to vector<8x128xf32>
    %105 = arith.mulf %104, %103 : vector<8x128xf32>
    %cst_50 = arith.constant 5.000000e-01 : f32
    %106 = vector.broadcast %cst_50 : f32 to vector<8x128xf32>
    %107 = arith.addf %105, %106 : vector<8x128xf32>
    %108 = vector.extract_strided_slice %99 {offsets = [0, 128], sizes = [8, 128], strides = [1, 1]} : vector<8x512xf32> to vector<8x128xf32>
    %cst_51 = arith.constant 5.000000e-01 : f32
    %109 = vector.broadcast %cst_51 : f32 to vector<8x128xf32>
    %110 = arith.mulf %109, %108 : vector<8x128xf32>
    %111 = math.tanh %110 : vector<8x128xf32>
    %cst_52 = arith.constant 5.000000e-01 : f32
    %112 = vector.broadcast %cst_52 : f32 to vector<8x128xf32>
    %113 = arith.mulf %112, %111 : vector<8x128xf32>
    %cst_53 = arith.constant 5.000000e-01 : f32
    %114 = vector.broadcast %cst_53 : f32 to vector<8x128xf32>
    %115 = arith.addf %113, %114 : vector<8x128xf32>
    %116 = vector.extract_strided_slice %99 {offsets = [0, 256], sizes = [8, 128], strides = [1, 1]} : vector<8x512xf32> to vector<8x128xf32>
    %117 = math.tanh %116 : vector<8x128xf32>
    %118 = vector.extract_strided_slice %99 {offsets = [0, 384], sizes = [8, 128], strides = [1, 1]} : vector<8x512xf32> to vector<8x128xf32>
    %cst_54 = arith.constant 5.000000e-01 : f32
    %119 = vector.broadcast %cst_54 : f32 to vector<8x128xf32>
    %120 = arith.mulf %119, %118 : vector<8x128xf32>
    %121 = math.tanh %120 : vector<8x128xf32>
    %cst_55 = arith.constant 5.000000e-01 : f32
    %122 = vector.broadcast %cst_55 : f32 to vector<8x128xf32>
    %123 = arith.mulf %122, %121 : vector<8x128xf32>
    %cst_56 = arith.constant 5.000000e-01 : f32
    %124 = vector.broadcast %cst_56 : f32 to vector<8x128xf32>
    %125 = arith.addf %123, %124 : vector<8x128xf32>
    %126 = arith.mulf %115, %88 : vector<8x128xf32>
    %127 = arith.mulf %107, %117 : vector<8x128xf32>
    %128 = arith.addf %126, %127 : vector<8x128xf32>
    %129 = math.tanh %128 : vector<8x128xf32>
    %130 = arith.mulf %125, %129 : vector<8x128xf32>
    %131 = arith.index_cast %94 : i32 to index
    %c0_57 = arith.constant 0 : index
    %132 = vector.load %arg17[%131, %c0_57] : memref<64x128xf32, #tpu.memory_space<vmem>>, vector<8x128xf32>
    tpu.vector_store %arg17[%131, %c0_57], %130 {strides = array<i32>} : memref<64x128xf32, #tpu.memory_space<vmem>>, vector<8x128xf32>,
    %c3_i32 = arith.constant 3 : i32
    %c8_i32_58 = arith.constant 8 : i32
    %133 = arith.muli %c3_i32, %c8_i32_58 : i32
    %134 = tpu.assume_multiple %133, 8 : i32
    %135 = arith.index_cast %134 : i32 to index
    %c0_59 = arith.constant 0 : index
    %136 = vector.load %arg16[%135, %c0_59] : memref<64x512xf32, #tpu.memory_space<vmem>>, vector<8x512xf32>
    %c0_60 = arith.constant 0 : index
    %c0_61 = arith.constant 0 : index
    %137 = vector.load %arg10[%c0_60, %c0_61] : memref<128x512xf32, #tpu.memory_space<vmem>>, vector<128x512xf32>
    %cst_62 = arith.constant dense<0.000000e+00> : vector<8x512xf32>
    %138 = tpu.matmul %130, %137, %cst_62 {dimension_numbers = #tpu.dot_dimension_numbers<[1], [0], [0], [1], [0, 0, 1, 1], [], []>} : vector<8x128xf32>, vector<128x512xf32>, vector<8x512xf32> -> vector<8x512xf32>
    %139 = arith.addf %136, %138 : vector<8x512xf32>
    %140 = vector.extract_strided_slice %139 {offsets = [0, 0], sizes = [8, 128], strides = [1, 1]} : vector<8x512xf32> to vector<8x128xf32>
    %cst_63 = arith.constant 5.000000e-01 : f32
    %141 = vector.broadcast %cst_63 : f32 to vector<8x128xf32>
    %142 = arith.mulf %141, %140 : vector<8x128xf32>
    %143 = math.tanh %142 : vector<8x128xf32>
    %cst_64 = arith.constant 5.000000e-01 : f32
    %144 = vector.broadcast %cst_64 : f32 to vector<8x128xf32>
    %145 = arith.mulf %144, %143 : vector<8x128xf32>
    %cst_65 = arith.constant 5.000000e-01 : f32
    %146 = vector.broadcast %cst_65 : f32 to vector<8x128xf32>
    %147 = arith.addf %145, %146 : vector<8x128xf32>
    %148 = vector.extract_strided_slice %139 {offsets = [0, 128], sizes = [8, 128], strides = [1, 1]} : vector<8x512xf32> to vector<8x128xf32>
    %cst_66 = arith.constant 5.000000e-01 : f32
    %149 = vector.broadcast %cst_66 : f32 to vector<8x128xf32>
    %150 = arith.mulf %149, %148 : vector<8x128xf32>
    %151 = math.tanh %150 : vector<8x128xf32>
    %cst_67 = arith.constant 5.000000e-01 : f32
    %152 = vector.broadcast %cst_67 : f32 to vector<8x128xf32>
    %153 = arith.mulf %152, %151 : vector<8x128xf32>
    %cst_68 = arith.constant 5.000000e-01 : f32
    %154 = vector.broadcast %cst_68 : f32 to vector<8x128xf32>
    %155 = arith.addf %153, %154 : vector<8x128xf32>
    %156 = vector.extract_strided_slice %139 {offsets = [0, 256], sizes = [8, 128], strides = [1, 1]} : vector<8x512xf32> to vector<8x128xf32>
    %157 = math.tanh %156 : vector<8x128xf32>
    %158 = vector.extract_strided_slice %139 {offsets = [0, 384], sizes = [8, 128], strides = [1, 1]} : vector<8x512xf32> to vector<8x128xf32>
    %cst_69 = arith.constant 5.000000e-01 : f32
    %159 = vector.broadcast %cst_69 : f32 to vector<8x128xf32>
    %160 = arith.mulf %159, %158 : vector<8x128xf32>
    %161 = math.tanh %160 : vector<8x128xf32>
    %cst_70 = arith.constant 5.000000e-01 : f32
    %162 = vector.broadcast %cst_70 : f32 to vector<8x128xf32>
    %163 = arith.mulf %162, %161 : vector<8x128xf32>
    %cst_71 = arith.constant 5.000000e-01 : f32
    %164 = vector.broadcast %cst_71 : f32 to vector<8x128xf32>
    %165 = arith.addf %163, %164 : vector<8x128xf32>
    %166 = arith.mulf %155, %128 : vector<8x128xf32>
    %167 = arith.mulf %147, %157 : vector<8x128xf32>
    %168 = arith.addf %166, %167 : vector<8x128xf32>
    %169 = math.tanh %168 : vector<8x128xf32>
    %170 = arith.mulf %165, %169 : vector<8x128xf32>
    %171 = arith.index_cast %134 : i32 to index
    %c0_72 = arith.constant 0 : index
    %172 = vector.load %arg17[%171, %c0_72] : memref<64x128xf32, #tpu.memory_space<vmem>>, vector<8x128xf32>
    tpu.vector_store %arg17[%171, %c0_72], %170 {strides = array<i32>} : memref<64x128xf32, #tpu.memory_space<vmem>>, vector<8x128xf32>,
    %c4_i32 = arith.constant 4 : i32
    %c8_i32_73 = arith.constant 8 : i32
    %173 = arith.muli %c4_i32, %c8_i32_73 : i32
    %174 = tpu.assume_multiple %173, 8 : i32
    %175 = arith.index_cast %174 : i32 to index
    %c0_74 = arith.constant 0 : index
    %176 = vector.load %arg16[%175, %c0_74] : memref<64x512xf32, #tpu.memory_space<vmem>>, vector<8x512xf32>
    %c0_75 = arith.constant 0 : index
    %c0_76 = arith.constant 0 : index
    %177 = vector.load %arg10[%c0_75, %c0_76] : memref<128x512xf32, #tpu.memory_space<vmem>>, vector<128x512xf32>
    %cst_77 = arith.constant dense<0.000000e+00> : vector<8x512xf32>
    %178 = tpu.matmul %170, %177, %cst_77 {dimension_numbers = #tpu.dot_dimension_numbers<[1], [0], [0], [1], [0, 0, 1, 1], [], []>} : vector<8x128xf32>, vector<128x512xf32>, vector<8x512xf32> -> vector<8x512xf32>
    %179 = arith.addf %176, %178 : vector<8x512xf32>
    %180 = vector.extract_strided_slice %179 {offsets = [0, 0], sizes = [8, 128], strides = [1, 1]} : vector<8x512xf32> to vector<8x128xf32>
    %cst_78 = arith.constant 5.000000e-01 : f32
    %181 = vector.broadcast %cst_78 : f32 to vector<8x128xf32>
    %182 = arith.mulf %181, %180 : vector<8x128xf32>
    %183 = math.tanh %182 : vector<8x128xf32>
    %cst_79 = arith.constant 5.000000e-01 : f32
    %184 = vector.broadcast %cst_79 : f32 to vector<8x128xf32>
    %185 = arith.mulf %184, %183 : vector<8x128xf32>
    %cst_80 = arith.constant 5.000000e-01 : f32
    %186 = vector.broadcast %cst_80 : f32 to vector<8x128xf32>
    %187 = arith.addf %185, %186 : vector<8x128xf32>
    %188 = vector.extract_strided_slice %179 {offsets = [0, 128], sizes = [8, 128], strides = [1, 1]} : vector<8x512xf32> to vector<8x128xf32>
    %cst_81 = arith.constant 5.000000e-01 : f32
    %189 = vector.broadcast %cst_81 : f32 to vector<8x128xf32>
    %190 = arith.mulf %189, %188 : vector<8x128xf32>
    %191 = math.tanh %190 : vector<8x128xf32>
    %cst_82 = arith.constant 5.000000e-01 : f32
    %192 = vector.broadcast %cst_82 : f32 to vector<8x128xf32>
    %193 = arith.mulf %192, %191 : vector<8x128xf32>
    %cst_83 = arith.constant 5.000000e-01 : f32
    %194 = vector.broadcast %cst_83 : f32 to vector<8x128xf32>
    %195 = arith.addf %193, %194 : vector<8x128xf32>
    %196 = vector.extract_strided_slice %179 {offsets = [0, 256], sizes = [8, 128], strides = [1, 1]} : vector<8x512xf32> to vector<8x128xf32>
    %197 = math.tanh %196 : vector<8x128xf32>
    %198 = vector.extract_strided_slice %179 {offsets = [0, 384], sizes = [8, 128], strides = [1, 1]} : vector<8x512xf32> to vector<8x128xf32>
    %cst_84 = arith.constant 5.000000e-01 : f32
    %199 = vector.broadcast %cst_84 : f32 to vector<8x128xf32>
    %200 = arith.mulf %199, %198 : vector<8x128xf32>
    %201 = math.tanh %200 : vector<8x128xf32>
    %cst_85 = arith.constant 5.000000e-01 : f32
    %202 = vector.broadcast %cst_85 : f32 to vector<8x128xf32>
    %203 = arith.mulf %202, %201 : vector<8x128xf32>
    %cst_86 = arith.constant 5.000000e-01 : f32
    %204 = vector.broadcast %cst_86 : f32 to vector<8x128xf32>
    %205 = arith.addf %203, %204 : vector<8x128xf32>
    %206 = arith.mulf %195, %168 : vector<8x128xf32>
    %207 = arith.mulf %187, %197 : vector<8x128xf32>
    %208 = arith.addf %206, %207 : vector<8x128xf32>
    %209 = math.tanh %208 : vector<8x128xf32>
    %210 = arith.mulf %205, %209 : vector<8x128xf32>
    %211 = arith.index_cast %174 : i32 to index
    %c0_87 = arith.constant 0 : index
    %212 = vector.load %arg17[%211, %c0_87] : memref<64x128xf32, #tpu.memory_space<vmem>>, vector<8x128xf32>
    tpu.vector_store %arg17[%211, %c0_87], %210 {strides = array<i32>} : memref<64x128xf32, #tpu.memory_space<vmem>>, vector<8x128xf32>,
    %c5_i32 = arith.constant 5 : i32
    %c8_i32_88 = arith.constant 8 : i32
    %213 = arith.muli %c5_i32, %c8_i32_88 : i32
    %214 = tpu.assume_multiple %213, 8 : i32
    %215 = arith.index_cast %214 : i32 to index
    %c0_89 = arith.constant 0 : index
    %216 = vector.load %arg16[%215, %c0_89] : memref<64x512xf32, #tpu.memory_space<vmem>>, vector<8x512xf32>
    %c0_90 = arith.constant 0 : index
    %c0_91 = arith.constant 0 : index
    %217 = vector.load %arg10[%c0_90, %c0_91] : memref<128x512xf32, #tpu.memory_space<vmem>>, vector<128x512xf32>
    %cst_92 = arith.constant dense<0.000000e+00> : vector<8x512xf32>
    %218 = tpu.matmul %210, %217, %cst_92 {dimension_numbers = #tpu.dot_dimension_numbers<[1], [0], [0], [1], [0, 0, 1, 1], [], []>} : vector<8x128xf32>, vector<128x512xf32>, vector<8x512xf32> -> vector<8x512xf32>
    %219 = arith.addf %216, %218 : vector<8x512xf32>
    %220 = vector.extract_strided_slice %219 {offsets = [0, 0], sizes = [8, 128], strides = [1, 1]} : vector<8x512xf32> to vector<8x128xf32>
    %cst_93 = arith.constant 5.000000e-01 : f32
    %221 = vector.broadcast %cst_93 : f32 to vector<8x128xf32>
    %222 = arith.mulf %221, %220 : vector<8x128xf32>
    %223 = math.tanh %222 : vector<8x128xf32>
    %cst_94 = arith.constant 5.000000e-01 : f32
    %224 = vector.broadcast %cst_94 : f32 to vector<8x128xf32>
    %225 = arith.mulf %224, %223 : vector<8x128xf32>
    %cst_95 = arith.constant 5.000000e-01 : f32
    %226 = vector.broadcast %cst_95 : f32 to vector<8x128xf32>
    %227 = arith.addf %225, %226 : vector<8x128xf32>
    %228 = vector.extract_strided_slice %219 {offsets = [0, 128], sizes = [8, 128], strides = [1, 1]} : vector<8x512xf32> to vector<8x128xf32>
    %cst_96 = arith.constant 5.000000e-01 : f32
    %229 = vector.broadcast %cst_96 : f32 to vector<8x128xf32>
    %230 = arith.mulf %229, %228 : vector<8x128xf32>
    %231 = math.tanh %230 : vector<8x128xf32>
    %cst_97 = arith.constant 5.000000e-01 : f32
    %232 = vector.broadcast %cst_97 : f32 to vector<8x128xf32>
    %233 = arith.mulf %232, %231 : vector<8x128xf32>
    %cst_98 = arith.constant 5.000000e-01 : f32
    %234 = vector.broadcast %cst_98 : f32 to vector<8x128xf32>
    %235 = arith.addf %233, %234 : vector<8x128xf32>
    %236 = vector.extract_strided_slice %219 {offsets = [0, 256], sizes = [8, 128], strides = [1, 1]} : vector<8x512xf32> to vector<8x128xf32>
    %237 = math.tanh %236 : vector<8x128xf32>
    %238 = vector.extract_strided_slice %219 {offsets = [0, 384], sizes = [8, 128], strides = [1, 1]} : vector<8x512xf32> to vector<8x128xf32>
    %cst_99 = arith.constant 5.000000e-01 : f32
    %239 = vector.broadcast %cst_99 : f32 to vector<8x128xf32>
    %240 = arith.mulf %239, %238 : vector<8x128xf32>
    %241 = math.tanh %240 : vector<8x128xf32>
    %cst_100 = arith.constant 5.000000e-01 : f32
    %242 = vector.broadcast %cst_100 : f32 to vector<8x128xf32>
    %243 = arith.mulf %242, %241 : vector<8x128xf32>
    %cst_101 = arith.constant 5.000000e-01 : f32
    %244 = vector.broadcast %cst_101 : f32 to vector<8x128xf32>
    %245 = arith.addf %243, %244 : vector<8x128xf32>
    %246 = arith.mulf %235, %208 : vector<8x128xf32>
    %247 = arith.mulf %227, %237 : vector<8x128xf32>
    %248 = arith.addf %246, %247 : vector<8x128xf32>
    %249 = math.tanh %248 : vector<8x128xf32>
    %250 = arith.mulf %245, %249 : vector<8x128xf32>
    %251 = arith.index_cast %214 : i32 to index
    %c0_102 = arith.constant 0 : index
    %252 = vector.load %arg17[%251, %c0_102] : memref<64x128xf32, #tpu.memory_space<vmem>>, vector<8x128xf32>
    tpu.vector_store %arg17[%251, %c0_102], %250 {strides = array<i32>} : memref<64x128xf32, #tpu.memory_space<vmem>>, vector<8x128xf32>,
    %c6_i32 = arith.constant 6 : i32
    %c8_i32_103 = arith.constant 8 : i32
    %253 = arith.muli %c6_i32, %c8_i32_103 : i32
    %254 = tpu.assume_multiple %253, 8 : i32
    %255 = arith.index_cast %254 : i32 to index
    %c0_104 = arith.constant 0 : index
    %256 = vector.load %arg16[%255, %c0_104] : memref<64x512xf32, #tpu.memory_space<vmem>>, vector<8x512xf32>
    %c0_105 = arith.constant 0 : index
    %c0_106 = arith.constant 0 : index
    %257 = vector.load %arg10[%c0_105, %c0_106] : memref<128x512xf32, #tpu.memory_space<vmem>>, vector<128x512xf32>
    %cst_107 = arith.constant dense<0.000000e+00> : vector<8x512xf32>
    %258 = tpu.matmul %250, %257, %cst_107 {dimension_numbers = #tpu.dot_dimension_numbers<[1], [0], [0], [1], [0, 0, 1, 1], [], []>} : vector<8x128xf32>, vector<128x512xf32>, vector<8x512xf32> -> vector<8x512xf32>
    %259 = arith.addf %256, %258 : vector<8x512xf32>
    %260 = vector.extract_strided_slice %259 {offsets = [0, 0], sizes = [8, 128], strides = [1, 1]} : vector<8x512xf32> to vector<8x128xf32>
    %cst_108 = arith.constant 5.000000e-01 : f32
    %261 = vector.broadcast %cst_108 : f32 to vector<8x128xf32>
    %262 = arith.mulf %261, %260 : vector<8x128xf32>
    %263 = math.tanh %262 : vector<8x128xf32>
    %cst_109 = arith.constant 5.000000e-01 : f32
    %264 = vector.broadcast %cst_109 : f32 to vector<8x128xf32>
    %265 = arith.mulf %264, %263 : vector<8x128xf32>
    %cst_110 = arith.constant 5.000000e-01 : f32
    %266 = vector.broadcast %cst_110 : f32 to vector<8x128xf32>
    %267 = arith.addf %265, %266 : vector<8x128xf32>
    %268 = vector.extract_strided_slice %259 {offsets = [0, 128], sizes = [8, 128], strides = [1, 1]} : vector<8x512xf32> to vector<8x128xf32>
    %cst_111 = arith.constant 5.000000e-01 : f32
    %269 = vector.broadcast %cst_111 : f32 to vector<8x128xf32>
    %270 = arith.mulf %269, %268 : vector<8x128xf32>
    %271 = math.tanh %270 : vector<8x128xf32>
    %cst_112 = arith.constant 5.000000e-01 : f32
    %272 = vector.broadcast %cst_112 : f32 to vector<8x128xf32>
    %273 = arith.mulf %272, %271 : vector<8x128xf32>
    %cst_113 = arith.constant 5.000000e-01 : f32
    %274 = vector.broadcast %cst_113 : f32 to vector<8x128xf32>
    %275 = arith.addf %273, %274 : vector<8x128xf32>
    %276 = vector.extract_strided_slice %259 {offsets = [0, 256], sizes = [8, 128], strides = [1, 1]} : vector<8x512xf32> to vector<8x128xf32>
    %277 = math.tanh %276 : vector<8x128xf32>
    %278 = vector.extract_strided_slice %259 {offsets = [0, 384], sizes = [8, 128], strides = [1, 1]} : vector<8x512xf32> to vector<8x128xf32>
    %cst_114 = arith.constant 5.000000e-01 : f32
    %279 = vector.broadcast %cst_114 : f32 to vector<8x128xf32>
    %280 = arith.mulf %279, %278 : vector<8x128xf32>
    %281 = math.tanh %280 : vector<8x128xf32>
    %cst_115 = arith.constant 5.000000e-01 : f32
    %282 = vector.broadcast %cst_115 : f32 to vector<8x128xf32>
    %283 = arith.mulf %282, %281 : vector<8x128xf32>
    %cst_116 = arith.constant 5.000000e-01 : f32
    %284 = vector.broadcast %cst_116 : f32 to vector<8x128xf32>
    %285 = arith.addf %283, %284 : vector<8x128xf32>
    %286 = arith.mulf %275, %248 : vector<8x128xf32>
    %287 = arith.mulf %267, %277 : vector<8x128xf32>
    %288 = arith.addf %286, %287 : vector<8x128xf32>
    %289 = math.tanh %288 : vector<8x128xf32>
    %290 = arith.mulf %285, %289 : vector<8x128xf32>
    %291 = arith.index_cast %254 : i32 to index
    %c0_117 = arith.constant 0 : index
    %292 = vector.load %arg17[%291, %c0_117] : memref<64x128xf32, #tpu.memory_space<vmem>>, vector<8x128xf32>
    tpu.vector_store %arg17[%291, %c0_117], %290 {strides = array<i32>} : memref<64x128xf32, #tpu.memory_space<vmem>>, vector<8x128xf32>,
    %c7_i32 = arith.constant 7 : i32
    %c8_i32_118 = arith.constant 8 : i32
    %293 = arith.muli %c7_i32, %c8_i32_118 : i32
    %294 = tpu.assume_multiple %293, 8 : i32
    %295 = arith.index_cast %294 : i32 to index
    %c0_119 = arith.constant 0 : index
    %296 = vector.load %arg16[%295, %c0_119] : memref<64x512xf32, #tpu.memory_space<vmem>>, vector<8x512xf32>
    %c0_120 = arith.constant 0 : index
    %c0_121 = arith.constant 0 : index
    %297 = vector.load %arg10[%c0_120, %c0_121] : memref<128x512xf32, #tpu.memory_space<vmem>>, vector<128x512xf32>
    %cst_122 = arith.constant dense<0.000000e+00> : vector<8x512xf32>
    %298 = tpu.matmul %290, %297, %cst_122 {dimension_numbers = #tpu.dot_dimension_numbers<[1], [0], [0], [1], [0, 0, 1, 1], [], []>} : vector<8x128xf32>, vector<128x512xf32>, vector<8x512xf32> -> vector<8x512xf32>
    %299 = arith.addf %296, %298 : vector<8x512xf32>
    %300 = vector.extract_strided_slice %299 {offsets = [0, 0], sizes = [8, 128], strides = [1, 1]} : vector<8x512xf32> to vector<8x128xf32>
    %cst_123 = arith.constant 5.000000e-01 : f32
    %301 = vector.broadcast %cst_123 : f32 to vector<8x128xf32>
    %302 = arith.mulf %301, %300 : vector<8x128xf32>
    %303 = math.tanh %302 : vector<8x128xf32>
    %cst_124 = arith.constant 5.000000e-01 : f32
    %304 = vector.broadcast %cst_124 : f32 to vector<8x128xf32>
    %305 = arith.mulf %304, %303 : vector<8x128xf32>
    %cst_125 = arith.constant 5.000000e-01 : f32
    %306 = vector.broadcast %cst_125 : f32 to vector<8x128xf32>
    %307 = arith.addf %305, %306 : vector<8x128xf32>
    %308 = vector.extract_strided_slice %299 {offsets = [0, 128], sizes = [8, 128], strides = [1, 1]} : vector<8x512xf32> to vector<8x128xf32>
    %cst_126 = arith.constant 5.000000e-01 : f32
    %309 = vector.broadcast %cst_126 : f32 to vector<8x128xf32>
    %310 = arith.mulf %309, %308 : vector<8x128xf32>
    %311 = math.tanh %310 : vector<8x128xf32>
    %cst_127 = arith.constant 5.000000e-01 : f32
    %312 = vector.broadcast %cst_127 : f32 to vector<8x128xf32>
    %313 = arith.mulf %312, %311 : vector<8x128xf32>
    %cst_128 = arith.constant 5.000000e-01 : f32
    %314 = vector.broadcast %cst_128 : f32 to vector<8x128xf32>
    %315 = arith.addf %313, %314 : vector<8x128xf32>
    %316 = vector.extract_strided_slice %299 {offsets = [0, 256], sizes = [8, 128], strides = [1, 1]} : vector<8x512xf32> to vector<8x128xf32>
    %317 = math.tanh %316 : vector<8x128xf32>
    %318 = vector.extract_strided_slice %299 {offsets = [0, 384], sizes = [8, 128], strides = [1, 1]} : vector<8x512xf32> to vector<8x128xf32>
    %cst_129 = arith.constant 5.000000e-01 : f32
    %319 = vector.broadcast %cst_129 : f32 to vector<8x128xf32>
    %320 = arith.mulf %319, %318 : vector<8x128xf32>
    %321 = math.tanh %320 : vector<8x128xf32>
    %cst_130 = arith.constant 5.000000e-01 : f32
    %322 = vector.broadcast %cst_130 : f32 to vector<8x128xf32>
    %323 = arith.mulf %322, %321 : vector<8x128xf32>
    %cst_131 = arith.constant 5.000000e-01 : f32
    %324 = vector.broadcast %cst_131 : f32 to vector<8x128xf32>
    %325 = arith.addf %323, %324 : vector<8x128xf32>
    %326 = arith.mulf %315, %288 : vector<8x128xf32>
    %327 = arith.mulf %307, %317 : vector<8x128xf32>
    %328 = arith.addf %326, %327 : vector<8x128xf32>
    %329 = math.tanh %328 : vector<8x128xf32>
    %330 = arith.mulf %325, %329 : vector<8x128xf32>
    %331 = arith.index_cast %294 : i32 to index
    %c0_132 = arith.constant 0 : index
    %332 = vector.load %arg17[%331, %c0_132] : memref<64x128xf32, #tpu.memory_space<vmem>>, vector<8x128xf32>
    tpu.vector_store %arg17[%331, %c0_132], %330 {strides = array<i32>} : memref<64x128xf32, #tpu.memory_space<vmem>>, vector<8x128xf32>,
    %c8_i32_133 = arith.constant 8 : i32
    %c0_134 = arith.constant 0 : index
    %c0_135 = arith.constant 0 : index
    %333 = vector.load %arg14[%c0_134, %c0_135] : memref<8x128xf32, #tpu.memory_space<vmem>>, vector<8x128xf32>
    tpu.vector_store %arg14[%c0_134, %c0_135], %330 {strides = array<i32>} : memref<8x128xf32, #tpu.memory_space<vmem>>, vector<8x128xf32>,
    %c0_136 = arith.constant 0 : index
    %c0_137 = arith.constant 0 : index
    %334 = vector.load %arg15[%c0_136, %c0_137] : memref<8x128xf32, #tpu.memory_space<vmem>>, vector<8x128xf32>
    tpu.vector_store %arg15[%c0_136, %c0_137], %328 {strides = array<i32>} : memref<8x128xf32, #tpu.memory_space<vmem>>, vector<8x128xf32>,
    %c0_138 = arith.constant 0 : index
    %c0_139 = arith.constant 0 : index
    %335 = vector.load %arg17[%c0_138, %c0_139] : memref<64x128xf32, #tpu.memory_space<vmem>>, vector<64x128xf32>
    %c0_140 = arith.constant 0 : index
    %c0_141 = arith.constant 0 : index
    %336 = vector.load %arg12[%c0_140, %c0_141] : memref<128x128xf32, #tpu.memory_space<vmem>>, vector<128x128xf32>
    %cst_142 = arith.constant dense<0.000000e+00> : vector<64x128xf32>
    %337 = tpu.matmul %335, %336, %cst_142 {dimension_numbers = #tpu.dot_dimension_numbers<[1], [0], [0], [1], [0, 0, 1, 1], [], []>} : vector<64x128xf32>, vector<128x128xf32>, vector<64x128xf32> -> vector<64x128xf32>
    %c0_143 = arith.constant 0 : index
    %c0_144 = arith.constant 0 : index
    %338 = vector.load %arg13[%c0_143, %c0_144] : memref<1x128xf32, #tpu.memory_space<vmem>>, vector<1x128xf32>
    %339 = vector.broadcast %338 : vector<1x128xf32> to vector<64x128xf32>
    %340 = arith.addf %337, %339 : vector<64x128xf32>
    %c0_145 = arith.constant 0 : index
    %c0_146 = arith.constant 0 : index
    %c0_147 = arith.constant 0 : index
    %341 = vector.load %arg8[%c0_145, %c0_146, %c0_147] : memref<1x64x128xf32, #tpu.memory_space<vmem>>, vector<1x64x128xf32>
    %342 = vector.shape_cast %341 : vector<1x64x128xf32> to vector<64x128xf32>
    %343 = vector.shape_cast %340 : vector<64x128xf32> to vector<1x64x128xf32>
    tpu.vector_store %arg8[%c0_145, %c0_146, %c0_147], %343 {strides = array<i32>} : memref<1x64x128xf32, #tpu.memory_space<vmem>>, vector<1x64x128xf32>,
    return
  }
  func.func @transform_0(%arg0: i32, %arg1: i32) -> (i32, i32, i32) {
    %c0_i32 = arith.constant 0 : i32
    %c0_i32_0 = arith.constant 0 : i32
    return %arg0, %arg1, %c0_i32 : i32, i32, i32
  }
  func.func @transform_6(%arg0: i32, %arg1: i32) -> (i32, i32, i32) {
    %c0_i32 = arith.constant 0 : i32
    %c0_i32_0 = arith.constant 0 : i32
    return %arg0, %arg1, %c0_i32 : i32, i32, i32
  }
}

</mosaic_0001>

<bundles_post_ra>
// kernel: tpu_custom_call.1
= control target key start
LH: loop header
LB: loop body
LE: loop exit
PB: predicated region body
PF: predicated region fallthrough
CT: control target
= control target key end

     0   :  { %11 = vsyncpa [#allocation12], 0  ;;  %s4151_s0 = inlined_call_operand.vmem [shape: f32[1,64,16], index: 0, kind: input, shape index: {}]   ;;  %s4152_s1 = inlined_call_operand.vmem [shape: f32[16,512], index: 1, kind: input, shape index: {}]   ;;  %s4153_s2 = inlined_call_operand.hbm [shape: f32[128,512], index: 2, kind: input, shape index: {}]   ;;  %s4154_s3 = inlined_call_operand.vmem [shape: f32[1,512], index: 3, kind: input, shape index: {}]   ;;  %s4155_s4 = inlined_call_operand.hbm [shape: f32[128,128], index: 4, kind: input, shape index: {}]   ;;  %s4156_s5 = inlined_call_operand.vmem [shape: f32[1,128], index: 5, kind: input, shape index: {}]   ;;  %s4157_s6 = inlined_call_operand.hbm [shape: f32[1,64,128], index: 6, kind: output, shape index: {}]  }
   0x1   :  { %v3527_v0 = vld [vmem:[%s4152_s1] sm:$0xff]  ;;  %v3532_v1 = vld [vmem:[%s4152_s1 + $0x8] sm:$0xff]  ;;  %v3537_v2 = vld [vmem:[%s4152_s1 + $0x10] sm:$0xff] }
   0x2   :  { %v3542_v3 = vld [vmem:[%s4152_s1 + $0x18] sm:$0xff]  ;;  %v3547_v4 = vld [vmem:[%s4152_s1 + $0x20] sm:$0xff]  ;;  %v3552_v5 = vld [vmem:[%s4152_s1 + $0x28] sm:$0xff] }
   0x3   :  { %v3557_v6 = vld [vmem:[%s4152_s1 + $0x30] sm:$0xff]  ;;  %v64_v7 = vld [vmem:[%s4152_s1 + $0x38] sm:$0xff] }
   0x4   :  { %73 = vsyncadd [#allocation13], 1024 }
   0x5   :  { %3471 = dma.done.wait [#allocation13], 1024 }
   0x6   :  { %3472 = vsyncadd [#allocation13], 4294966272 }
   0x7   :  { %s3483_s13 = smov [#allocation3]   ;;  %s3405_s17 = scalar_lea.hbm %s4153_s2, 8192 }
   0x8   :  { %s85_s14 = sshll.u32 %s3483_s13, 4  ;;  %p3406_p0 = scmp.ne.s32.totalorder %s4153_s2, %s3405_s17  ;;  %s86_s14 = int_to_ptr.vmem [resolvable:$true] %s85_s14 }
   0x9   :  { %p3409_p1 = scmp.lt.u32.totalorder %s3405_s17, %s4153_s2 }
   0xb   :  { %p3411_p2 = pnand %p3409_p1, %p3406_p0 }
   0xd   :  { %3414 = shalt.err (!%p3411_p2)  }
   0xe   :  { %s3415_s1 = scalar_lea.vmem %s86_s14, 8192  ;;  %p3420_p4 = scmp.lt.s32.totalorder %s86_s14, %s86_s14 }
   0xf   :  { %p3416_p3 = scmp.ne.s32.totalorder %s86_s14, %s3415_s1  ;;  %p3421_p5 = scmp.lt.s32.totalorder %s3415_s1, %s3415_s1 }
  0x11   :  { %p3422_p6 = por %p3421_p5, %p3420_p4 }
  0x13   :  { %p3423_p7 = pnand %p3422_p6, %p3416_p3 }
  0x15   :  { %3426 = shalt.err (!%p3423_p7)  }
  0x16   :  { %88 = dma.hbm_to_vmem [thread:$0]  %s4153_s2, 8192, %s86_s14, [#allocation15] }
  0x17   :  { %3473 = dma.done.wait [#allocation15], 8192 }
  0x18   :  { %3474 = vsyncadd [#allocation15], 4294959104 }
  0x19   :  { %v110_v8 = vld [vmem:[%s4154_s3] sm:$0xf] }
  0x1a   :  { %111 = vst [vmem:[#allocation4] sm:$0xf] %v110_v8 }
  0x1b   :  { %136 = vsyncadd [#allocation20], 64 }
  0x1c   :  { %3475 = dma.done.wait [#allocation20], 64 }
  0x1d   :  { %3476 = vsyncadd [#allocation20], 4294967232 }
  0x1e   :  { %s3484_s26 = smov [#allocation5]   ;;  %s3427_s30 = scalar_lea.hbm %s4155_s4, 2048 }
  0x1f   :  { %s147_s27 = sshll.u32 %s3484_s26, 4  ;;  %p3428_p8 = scmp.ne.s32.totalorder %s4155_s4, %s3427_s30  ;;  %s148_s27 = int_to_ptr.vmem [resolvable:$true] %s147_s27 }
  0x20   :  { %p3431_p9 = scmp.lt.u32.totalorder %s3427_s30, %s4155_s4 }
  0x22   :  { %p3433_p10 = pnand %p3431_p9, %p3428_p8 }
  0x24   :  { %3436 = shalt.err (!%p3433_p10)  }
  0x25   :  { %s3437_s3 = scalar_lea.vmem %s148_s27, 2048  ;;  %p3442_p12 = scmp.lt.s32.totalorder %s148_s27, %s148_s27 }
  0x26   :  { %p3438_p11 = scmp.ne.s32.totalorder %s148_s27, %s3437_s3  ;;  %p3443_p13 = scmp.lt.s32.totalorder %s3437_s3, %s3437_s3 }
  0x28   :  { %p3444_p0 = por %p3443_p13, %p3442_p12 }
  0x2a   :  { %p3445_p1 = pnand %p3444_p0, %p3438_p11 }
  0x2c   :  { %3448 = shalt.err (!%p3445_p1)  }
  0x2d   :  { %150 = dma.hbm_to_vmem [thread:$0]  %s4155_s4, 2048, %s148_s27, [#allocation22] }
  0x2e   :  { %3477 = dma.done.wait [#allocation22], 2048 }
  0x2f   :  { %3478 = vsyncadd [#allocation22], 4294965248 }
  0x30   :  { %v171_v9 = vld [vmem:[%s4156_s5] sm:$0x1] }
  0x31   :  { %172 = vst [vmem:[#allocation6] sm:$0x1] %v171_v9 }
  0x32   :  { %197 = vsyncadd [#allocation25], 16 }
  0x33   :  { %3479 = dma.done.wait [#allocation25], 16 }
  0x34   :  { %3480 = vsyncadd [#allocation25], 4294967280  ;;  %v2707_v10 = vpack.c.bf16 %v64_v7, %v3542_v3  ;;  %v2709_v11 = vpack.c.bf16 %v3557_v6, %v3537_v2  ;;  %v534_v12 = vld [vmem:[#allocation3 + $0x8] sm:$0xff]  ;;  %v3485_v14 = vmov 0.0   ;;  %v533_v16 = vld [vmem:[#allocation3] sm:$0xff]  ;;  %v2703_v18 = vpack.c.bf16 %v3552_v5, %v3532_v1 }
  0x35   :  { %v538_v13 = vld [vmem:[#allocation3 + $0x28] sm:$0xff]  ;;  %443 = vmatprep.mubr.f32.mxu1 %v3485_v14  ;;  %v537_v17 = vld [vmem:[#allocation3 + $0x20] sm:$0xff]  ;;  %v2705_v19 = vpack.c.bf16 %v3547_v4, %v3527_v0  ;;  %330 = vmatprep.mubr.f32.mxu0 %v3485_v14  ;;  %vm241_vm0 = vcmask 130048   ;;  %v205_v36 = vld [vmem:[%s4151_s0 + $0x10] sm:$0xff] }
  0x36   :  { %v3596_v15 = vpack.c.bf16 %v538_v13, %v534_v12  ;;  %2708 = vmatprep.subr.bf16.mxu1 %v2707_v10  ;;  %v542_v20 = vld [vmem:[#allocation3 + $0x48] sm:$0xff]  ;;  %v203_v22 = vld [vmem:[%s4151_s0] sm:$0xff]  ;;  %v3606_v23 = vpack.c.bf16 %v537_v17, %v533_v16  ;;  %2704 = vmatprep.subr.bf16.mxu0 %v2703_v18  ;;  %v206_v43 = vld [vmem:[%s4151_s0 + $0x18] sm:$0xff] }
  0x37   :  { %v546_v21 = vld [vmem:[#allocation3 + $0x68] sm:$0xff]  ;;  %2710 = vmatpush1.bf16.msra.mxu1 %v2709_v11  ;;  %v541_v25 = vld [vmem:[#allocation3 + $0x40] sm:$0xff]  ;;  %2706 = vmatpush1.bf16.msra.mxu0 %v2705_v19  ;;  %v209_v0 = vld [vmem:[%s4151_s0 + $0x30] sm:$0xff] }
  0x38   :  { %2712 = vmatprep.subr.bf16.mxu1 %v3596_v15  ;;  %v3609_v24 = vpack.c.bf16 %v546_v21, %v542_v20  ;;  %v545_v26 = vld [vmem:[#allocation3 + $0x60] sm:$0xff]  ;;  %v550_v27 = vld [vmem:[#allocation3 + $0x88] sm:$0xff]  ;;  %2776 = vmatprep.subr.bf16.mxu0 %v3596_v15  ;;  %v536_v5 = vld [vmem:[#allocation3 + $0x18] sm:$0xff] }
  0x39   :  { %v554_v28 = vld [vmem:[#allocation3 + $0xa8] sm:$0xff]  ;;  %v3618_v30 = vpack.c.bf16 %v545_v26, %v541_v25  ;;  %v549_v32 = vld [vmem:[#allocation3 + $0x80] sm:$0xff]  ;;  %v540_v6 = vld [vmem:[#allocation3 + $0x38] sm:$0xff] }
  0x3a   :  { %2626 = vmatmul.mubr.msk.f32.vlgmr.msra.gmra.mrb[0].mxu1 %vm241_vm0, %v203_v22  ;;  %v204_v29 = vld [vmem:[%s4151_s0 + $0x8] sm:$0xff]  ;;  %v3621_v31 = vpack.c.bf16 %v554_v28, %v550_v27  ;;  %v553_v33 = vld [vmem:[#allocation3 + $0xa0] sm:$0xff]  ;;  %2618 = vmatmul.mubr.msk.f32.vlgmr.msra.gmra.mrb[0].mxu0 %vm241_vm0, %v203_v22  ;;  %v210_v7 = vld [vmem:[%s4151_s0 + $0x38] sm:$0xff]  ;;  %v3711_v9 = vpack.c.bf16 %v540_v6, %v536_v5 }
  0x3b   :  { %2714 = vmatpush1.bf16.msra.mxu1 %v3606_v23  ;;  %449 = vmatprep.mubr.f32.mxu1 %v3485_v14  ;;  %v558_v34 = vld [vmem:[#allocation3 + $0xc8] sm:$0xff]  ;;  %v3633_v37 = vpack.c.bf16 %v553_v33, %v549_v32  ;;  %v557_v39 = vld [vmem:[#allocation3 + $0xc0] sm:$0xff]  ;;  %v535_v10 = vld [vmem:[#allocation3 + $0x10] sm:$0xff] }
  0x3c   :  { %2716 = vmatprep.subr.bf16.mxu1 %v3609_v24  ;;  %v562_v35 = vld [vmem:[#allocation3 + $0xe8] sm:$0xff]  ;;  %2778 = vmatpush1.bf16.msra.mxu0 %v3606_v23  ;;  %v561_v40 = vld [vmem:[#allocation3 + $0xe0] sm:$0xff]  ;;  %v539_v11 = vld [vmem:[#allocation3 + $0x30] sm:$0xff] }
  0x3d   :  { %336 = vmatprep.mubr.f32.mxu0 %v3485_v14  ;;  %2780 = vmatprep.subr.bf16.mxu0 %v3609_v24  ;;  %v3636_v38 = vpack.c.bf16 %v562_v35, %v558_v34  ;;  %v566_v41 = vld [vmem:[#allocation3 + $0x108] sm:$0xff]  ;;  %v3648_v44 = vpack.c.bf16 %v561_v40, %v557_v39  ;;  %v565_v46 = vld [vmem:[#allocation3 + $0x100] sm:$0xff]  ;;  %v544_v12 = vld [vmem:[#allocation3 + $0x58] sm:$0xff]  ;;  %v3720_v16 = vpack.c.bf16 %v539_v11, %v535_v10  ;;  %v221_v10 = vlaneseq }
  0x3e   :  { %2627 = vmatmul.mubr.msk.f32.gmra.mrb[2].mxu1 %vm241_vm0, %v204_v29  ;;  %2619 = vmatmul.mubr.msk.f32.gmra.mrb[2].mxu0 %vm241_vm0, %v204_v29  ;;  %v570_v42 = vld [vmem:[#allocation3 + $0x128] sm:$0xff]  ;;  %v569_v47 = vld [vmem:[#allocation3 + $0x120] sm:$0xff]  ;;  %v548_v13 = vld [vmem:[#allocation3 + $0x78] sm:$0xff] }
  0x3f   :  { %2718 = vmatpush1.bf16.msra.mxu1 %v3618_v30  ;;  %455 = vmatprep.mubr.f32.mxu1 %v3485_v14  ;;  %v3651_v45 = vpack.c.bf16 %v570_v42, %v566_v41  ;;  %v574_v48 = vld [vmem:[#allocation3 + $0x148] sm:$0xff]  ;;  %v207_v50 = vld [vmem:[%s4151_s0 + $0x20] sm:$0xff]  ;;  %v3663_v51 = vpack.c.bf16 %v569_v47, %v565_v46  ;;  %v3723_v17 = vpack.c.bf16 %v548_v13, %v544_v12  ;;  %v543_v18 = vld [vmem:[#allocation3 + $0x50] sm:$0xff]  ;;  %v222_v11 = vshrl.u32 %v221_v10, 7 }
  0x40   :  { %2720 = vmatprep.subr.bf16.mxu1 %v3621_v31  ;;  %2782 = vmatpush1.bf16.msra.mxu0 %v3618_v30  ;;  %v578_v49 = vld [vmem:[#allocation3 + $0x168] sm:$0xff]  ;;  %v573_v53 = vld [vmem:[#allocation3 + $0x140] sm:$0xff]  ;;  %v547_v19 = vld [vmem:[#allocation3 + $0x70] sm:$0xff] }
  0x41   :  { %342 = vmatprep.mubr.f32.mxu0 %v3485_v14  ;;  %2784 = vmatprep.subr.bf16.mxu0 %v3621_v31  ;;  %v3666_v52 = vpack.c.bf16 %v578_v49, %v574_v48  ;;  %v577_v54 = vld [vmem:[#allocation3 + $0x160] sm:$0xff]  ;;  %v582_v55 = vld [vmem:[#allocation3 + $0x188] sm:$0xff]  ;;  %v552_v20 = vld [vmem:[#allocation3 + $0x98] sm:$0xff]  ;;  %v3731_v22 = vpack.c.bf16 %v547_v19, %v543_v18  ;;  %v223_v12 = vsub.s32 0, %v222_v11  ;;  %v227_v18 = vsub.s32 1, %v222_v11 }
  0x42   :  { %2628 = vmatmul.mubr.msk.f32.gmra.mrb[4].mxu1 %vm241_vm0, %v205_v36  ;;  %2620 = vmatmul.mubr.msk.f32.gmra.mrb[4].mxu0 %vm241_vm0, %v205_v36  ;;  %v586_v56 = vld [vmem:[#allocation3 + $0x1a8] sm:$0xff]  ;;  %v3678_v58 = vpack.c.bf16 %v577_v54, %v573_v53  ;;  %v581_v60 = vld [vmem:[#allocation3 + $0x180] sm:$0xff]  ;;  %v556_v21 = vld [vmem:[#allocation3 + $0xb8] sm:$0xff] }
  0x43   :  { %2722 = vmatpush1.bf16.msra.mxu1 %v3633_v37  ;;  %461 = vmatprep.mubr.f32.mxu1 %v3485_v14  ;;  %v208_v57 = vld [vmem:[%s4151_s0 + $0x28] sm:$0xff]  ;;  %v3681_v59 = vpack.c.bf16 %v586_v56, %v582_v55  ;;  %v585_v61 = vld [vmem:[#allocation3 + $0x1a0] sm:$0xff]  ;;  %v3735_v25 = vpack.c.bf16 %v556_v21, %v552_v20  ;;  %v551_v26 = vld [vmem:[#allocation3 + $0x90] sm:$0xff]  ;;  %s3486_s0 = smov [#allocation11]  }
  0x44   :  { %2724 = vmatprep.subr.bf16.mxu1 %v3636_v38  ;;  %2786 = vmatpush1.bf16.msra.mxu0 %v3633_v37  ;;  %v590_v62 = vld [vmem:[#allocation3 + $0x1c8] sm:$0xff]  ;;  %v3693_v1 = vpack.c.bf16 %v585_v61, %v581_v60  ;;  %v589_v3 = vld [vmem:[#allocation3 + $0x1c0] sm:$0xff]  ;;  %v555_v27 = vld [vmem:[#allocation3 + $0xb0] sm:$0xff]  ;;  %s2572_s27 = sshll.u32 %s3486_s0, 4  ;;  %s2573_s27 = int_to_ptr.vmem [resolvable:$true] %s2572_s27 }
  0x45   :  { %348 = vmatprep.mubr.f32.mxu0 %v3485_v14  ;;  %2788 = vmatprep.subr.bf16.mxu0 %v3636_v38  ;;  %v594_v63 = vld [vmem:[#allocation3 + $0x1e8] sm:$0xff]  ;;  %v593_v4 = vld [vmem:[#allocation3 + $0x1e0] sm:$0xff]  ;;  %v560_v28 = vld [vmem:[#allocation3 + $0xd8] sm:$0xff]  ;;  %v3738_v32 = vpack.c.bf16 %v555_v27, %v551_v26  ;;  %s3449_s28 = scalar_lea.vmem %s2573_s27, 1024  ;;  %p3454_p3 = scmp.lt.s32.totalorder %s2573_s27, %s2573_s27 }
  0x46   :  { %2629 = vmatmul.mubr.msk.f32.gmra.mrb[6].mxu1 %vm241_vm0, %v206_v43  ;;  %2621 = vmatmul.mubr.msk.f32.gmra.mrb[6].mxu0 %vm241_vm0, %v206_v43  ;;  %v3696_v2 = vpack.c.bf16 %v594_v63, %v590_v62  ;;  %v3708_v8 = vpack.c.bf16 %v593_v4, %v589_v3  ;;  %v564_v29 = vld [vmem:[#allocation3 + $0xf8] sm:$0xff]  ;;  %v559_v33 = vld [vmem:[#allocation3 + $0xd0] sm:$0xff]  ;;  %v219_v13 = vld [vmem:[#allocation4] sm:$0xf]  ;;  %p3450_p2 = scmp.ne.s32.totalorder %s2573_s27, %s3449_s28  ;;  %p3455_p4 = scmp.lt.s32.totalorder %s3449_s28, %s3449_s28 }
  0x47   :  { %2726 = vmatpush1.bf16.msra.mxu1 %v3648_v44  ;;  %467 = vmatprep.mubr.f32.mxu1 %v3485_v14  ;;  %v563_v34 = vld [vmem:[#allocation3 + $0xf0] sm:$0xff]  ;;  %v568_v35 = vld [vmem:[#allocation3 + $0x118] sm:$0xff]  ;;  %v3791_v19 = vrot.slane %v219_v13, %v223_v12  ;;  %v3793_v20 = vrot.slane %v219_v13, %v227_v18 }
  0x48   :  { %2728 = vmatprep.subr.bf16.mxu1 %v3651_v45  ;;  %2790 = vmatpush1.bf16.msra.mxu0 %v3648_v44  ;;  %v572_v36 = vld [vmem:[#allocation3 + $0x138] sm:$0xff]  ;;  %v3744_v39 = vpack.c.bf16 %v563_v34, %v559_v33  ;;  %v567_v41 = vld [vmem:[#allocation3 + $0x110] sm:$0xff]  ;;  %p3456_p5 = por %p3455_p4, %p3454_p3 }
  0x49   :  { %354 = vmatprep.mubr.f32.mxu0 %v3485_v14  ;;  %2792 = vmatprep.subr.bf16.mxu0 %v3651_v45  ;;  %v3747_v40 = vpack.c.bf16 %v572_v36, %v568_v35  ;;  %v571_v42 = vld [vmem:[#allocation3 + $0x130] sm:$0xff]  ;;  %v576_v43 = vld [vmem:[#allocation3 + $0x158] sm:$0xff]  ;;  %v231_v36 = vsub.s32 2, %v222_v11 }
  0x4a   :  { %2630 = vmatmul.mubr.msk.f32.gmra.mrb[8].mxu1 %vm241_vm0, %v207_v50  ;;  %2622 = vmatmul.mubr.msk.f32.gmra.mrb[8].mxu0 %vm241_vm0, %v207_v50  ;;  %v580_v46 = vld [vmem:[#allocation3 + $0x178] sm:$0xff]  ;;  %v3750_v47 = vpack.c.bf16 %v571_v42, %v567_v41  ;;  %v575_v49 = vld [vmem:[#allocation3 + $0x150] sm:$0xff]  ;;  %v235_v41 = vsub.s32 3, %v222_v11  ;;  %p3457_p6 = pnand %p3456_p5, %p3450_p2 }
  0x4b   :  { %2730 = vmatpush1.bf16.msra.mxu1 %v3663_v51  ;;  %473 = vmatprep.mubr.f32.mxu1 %v3485_v14  ;;  %v3753_v48 = vpack.c.bf16 %v580_v46, %v576_v43  ;;  %v579_v50 = vld [vmem:[#allocation3 + $0x170] sm:$0xff]  ;;  %v584_v53 = vld [vmem:[#allocation3 + $0x198] sm:$0xff]  ;;  %v3797_v42 = vrot.slane %v219_v13, %v231_v36 }
  0x4c   :  { %2732 = vmatprep.subr.bf16.mxu1 %v3666_v52  ;;  %2794 = vmatpush1.bf16.msra.mxu0 %v3663_v51  ;;  %v588_v54 = vld [vmem:[#allocation3 + $0x1b8] sm:$0xff]  ;;  %v3756_v55 = vpack.c.bf16 %v579_v50, %v575_v49  ;;  %v587_v60 = vld [vmem:[#allocation3 + $0x1b0] sm:$0xff]  ;;  %v3799_v43 = vrot.slane %v219_v13, %v235_v41 }
  0x4d   :  { %360 = vmatprep.mubr.f32.mxu0 %v3485_v14  ;;  %2796 = vmatprep.subr.bf16.mxu0 %v3666_v52  ;;  %v3759_v56 = vpack.c.bf16 %v588_v54, %v584_v53  ;;  %v592_v61 = vld [vmem:[#allocation3 + $0x1d8] sm:$0xff]  ;;  %v591_v3 = vld [vmem:[#allocation3 + $0x1d0] sm:$0xff] }
  0x4e   :  { %2631 = vmatmul.mubr.msk.f32.gmra.mrb[10].mxu1 %vm241_vm0, %v208_v57  ;;  %2623 = vmatmul.mubr.msk.f32.gmra.mrb[10].mxu0 %vm241_vm0, %v208_v57  ;;  %v583_v57 = vld [vmem:[#allocation3 + $0x190] sm:$0xff]  ;;  %v596_v62 = vld [vmem:[#allocation3 + $0x1f8] sm:$0xff] }
  0x4f   :  { %2734 = vmatpush1.bf16.msra.mxu1 %v3678_v58  ;;  %479 = vmatprep.mubr.f32.mxu1 %v3485_v14  ;;  %v3762_v63 = vpack.c.bf16 %v587_v60, %v583_v57  ;;  %v595_v4 = vld [vmem:[#allocation3 + $0x1f0] sm:$0xff] }
  0x50   :  { %2736 = vmatprep.subr.bf16.mxu1 %v3681_v59  ;;  %2798 = vmatpush1.bf16.msra.mxu0 %v3678_v58  ;;  %v3768_v5 = vpack.c.bf16 %v595_v4, %v591_v3 }
  0x51   :  { %366 = vmatprep.mubr.f32.mxu0 %v3485_v14  ;;  %2800 = vmatprep.subr.bf16.mxu0 %v3681_v59 }
  0x52   :  { %2632 = vmatmul.mubr.msk.f32.gmra.mrb[12].mxu1 %vm241_vm0, %v209_v0  ;;  %2624 = vmatmul.mubr.msk.f32.gmra.mrb[12].mxu0 %vm241_vm0, %v209_v0  ;;  %v3765_v0 = vpack.c.bf16 %v596_v62, %v592_v61 }
  0x53   :  { %2738 = vmatpush1.bf16.msra.mxu1 %v3693_v1  ;;  %485 = vmatprep.mubr.f32.mxu1 %v3485_v14 }
  0x54   :  { %2740 = vmatprep.subr.bf16.mxu1 %v3696_v2  ;;  %2802 = vmatpush1.bf16.msra.mxu0 %v3693_v1 }
  0x55   :  { %372 = vmatprep.mubr.f32.mxu0 %v3485_v14  ;;  %2804 = vmatprep.subr.bf16.mxu0 %v3696_v2 }
  0x56   :  { %2633 = vmatmul.mubr.msk.f32.gmra.mrb[14].mxu1 %vm241_vm0, %v210_v7  ;;  %2625 = vmatmul.mubr.msk.f32.gmra.mrb[14].mxu0 %vm241_vm0, %v210_v7 }
  0x57   :  { %2742 = vmatpush1.bf16.msra.mxu1 %v3708_v8  ;;  %661 = vmatprep.mubr.f32.mxu1 %v3485_v14 }
  0x58   :  { %2744 = vmatprep.subr.bf16.mxu1 %v3711_v9  ;;  %2806 = vmatpush1.bf16.msra.mxu0 %v3708_v8 }
  0x59   :  { %897 = vmatprep.mubr.f32.mxu0 %v3485_v14  ;;  %2840 = vmatprep.subr.bf16.mxu0 %v3596_v15  ;;  %v3741_v15 = vpack.c.bf16 %v564_v29, %v560_v28 }
  0x5a   :  { %662 = vmatmul.mubr.f32.vlgmr.msra.gmra.mrb[16].mxu1 %v3485_v14 }
  0x5b   :  { %2746 = vmatpush1.bf16.msra.mxu1 %v3720_v16  ;;  %732 = vmatprep.mubr.f32.mxu1 %v3485_v14 }
  0x5c   :  { %2748 = vmatprep.subr.bf16.mxu1 %v3723_v17 }
  0x5f   :  { %2750 = vmatpush1.bf16.msra.mxu1 %v3731_v22 }
  0x60   :  { %2752 = vmatprep.subr.bf16.mxu1 %v3735_v25 }
  0x63   :  { %2754 = vmatpush1.bf16.msra.mxu1 %v3738_v32 }
  0x64   :  { %2756 = vmatprep.subr.bf16.mxu1 %v3741_v15 }
  0x67   :  { %2758 = vmatpush1.bf16.msra.mxu1 %v3744_v39 }
  0x68   :  { %2760 = vmatprep.subr.bf16.mxu1 %v3747_v40 }
  0x6b   :  { %2762 = vmatpush1.bf16.msra.mxu1 %v3750_v47 }
  0x6c   :  { %2764 = vmatprep.subr.bf16.mxu1 %v3753_v48 }
  0x6f   :  { %2766 = vmatpush1.bf16.msra.mxu1 %v3756_v55 }
  0x70   :  { %2768 = vmatprep.subr.bf16.mxu1 %v3759_v56 }
  0x73   :  { %2770 = vmatpush1.bf16.msra.mxu1 %v3762_v63 }
  0x74   :  { %2772 = vmatprep.subr.bf16.mxu1 %v3765_v0 }
  0x77   :  { %2774 = vmatpush1.bf16.msra.mxu1 %v3768_v5 }
  0x78   :  { %2808 = vmatprep.subr.bf16.mxu1 %v3711_v9 }
  0x7a   :  { %733 = vmatmul.mubr.f32.vlgmr.msra.gmra.mrb[0].mxu1 %v3485_v14 }
  0x7b   :  { %2810 = vmatpush1.bf16.msra.mxu1 %v3720_v16  ;;  %968 = vmatprep.mubr.f32.mxu1 %v3485_v14 }
  0x7c   :  { %2812 = vmatprep.subr.bf16.mxu1 %v3723_v17 }
  0x7f   :  { %2814 = vmatpush1.bf16.msra.mxu1 %v3731_v22 }
  0x80   :  { %2816 = vmatprep.subr.bf16.mxu1 %v3735_v25 }
  0x83   :  { %2818 = vmatpush1.bf16.msra.mxu1 %v3738_v32 }
  0x84   :  { %2820 = vmatprep.subr.bf16.mxu1 %v3741_v15 }
  0x87   :  { %2822 = vmatpush1.bf16.msra.mxu1 %v3744_v39 }
  0x88   :  { %2824 = vmatprep.subr.bf16.mxu1 %v3747_v40 }
  0x8b   :  { %2826 = vmatpush1.bf16.msra.mxu1 %v3750_v47 }
  0x8c   :  { %2828 = vmatprep.subr.bf16.mxu1 %v3753_v48 }
  0x8f   :  { %2830 = vmatpush1.bf16.msra.mxu1 %v3756_v55 }
  0x90   :  { %2832 = vmatprep.subr.bf16.mxu1 %v3759_v56 }
  0x93   :  { %2834 = vmatpush1.bf16.msra.mxu1 %v3762_v63 }
  0x94   :  { %2836 = vmatprep.subr.bf16.mxu1 %v3765_v0 }
  0x97   :  { %2838 = vmatpush1.bf16.msra.mxu1 %v3768_v5 }
  0x98   :  { %2872 = vmatprep.subr.bf16.mxu1 %v3711_v9 }
 0x10d   :  { %v332_v6 = vpop.f32.mrb[0].mxu0 }
 0x10e   :  { %v334_v7 = vpop.f32.mrb[1].mxu0  ;;  %v333_v21 = vadd.f32 %v332_v6, %v3791_v19 }
 0x10f   :  { %v335_v26 = vadd.f32 %v334_v7, %v3793_v20 }
 0x12d   :  { %v663_v27 = vpop.f32.mrb[16].mxu1 }
 0x12e   :  { %v739_v28 = vadd.f32 %v663_v27, %v333_v21  ;;  %v665_v29 = vpop.f32.mrb[17].mxu1 }
 0x12f   :  { %v740_v33 = vadd.f32 %v665_v29, %v335_v26 }
 0x130   :  { %v743_v35 = vmul.f32 0.5, %v739_v28 }
 0x131   :  { %v747_v34 = vmul.f32 0.5, %v740_v33 }
 0x133   :  { %3325 = vtanh.f32 %v747_v34 }
 0x134   :  { %3327 = vtanh.f32 %v743_v35 }
 0x13d   :  { %v3326_v54 = vpop.eup %3325 }
 0x13e   :  { %v3328_v57 = vpop.eup %3327  ;;  %v749_v60 = vmul.f32 0.5, %v3326_v54 }
 0x13f   :  { %v745_v62 = vmul.f32 0.5, %v3328_v57  ;;  %v1268_v57 = vld [vmem:[#allocation3 + $0xc8] sm:$0xff] }
 0x140   :  { %v750_v3 = vadd.f32 0.5, %v749_v60  ;;  %v1272_v60 = vld [vmem:[#allocation3 + $0xe8] sm:$0xff] }
 0x141   :  { %v746_v4 = vadd.f32 0.5, %v745_v62  ;;  %v1267_v62 = vld [vmem:[#allocation3 + $0xc0] sm:$0xff] }
 0x142   :  { %v756_v7 = vmul.f32 0.0, %v750_v3  ;;  %v1271_v3 = vld [vmem:[#allocation3 + $0xe0] sm:$0xff] }
 0x14d   :  { %v734_v46 = vpop.f32.mrb[0].mxu1 }
 0x14e   :  { %v3273_v49 = vadd.f32 %v734_v46, %v3797_v42  ;;  %v736_v50 = vpop.f32.mrb[1].mxu1 }
 0x14f   :  { %v3274_v53 = vadd.f32 %v736_v50, %v3799_v43  ;;  %v1259_v50 = vld [vmem:[#allocation3 + $0x80] sm:$0xff] }
 0x150   :  { %3329 = vtanh.f32 %v3273_v49 }
 0x151   :  { %v752_v61 = vmul.f32 0.5, %v3274_v53  ;;  %v1263_v53 = vld [vmem:[#allocation3 + $0xa0] sm:$0xff] }
 0x152   :  { %v3886_v54 = vpack.c.bf16 %v1263_v53, %v1259_v50 }
 0x153   :  { %3331 = vtanh.f32 %v752_v61  ;;  %v3890_v61 = vpack.c.bf16 %v1272_v60, %v1268_v57 }
 0x15a   :  { %v3330_v6 = vpop.eup %3329 }
 0x15b   :  { %v757_v10 = vmul.f32 %v3330_v6, %v746_v4  ;;  %v3892_v4 = vpack.c.bf16 %v1271_v3, %v1267_v62  ;;  %v1276_v6 = vld [vmem:[#allocation3 + $0x108] sm:$0xff] }
 0x15d   :  { %v3803_v11 = vadd.f32 %v757_v10, %v756_v7  ;;  %v3332_v12 = vpop.eup %3331  ;;  %v1280_v7 = vld [vmem:[#allocation3 + $0x128] sm:$0xff] }
 0x15e   :  { %v754_v13 = vmul.f32 0.5, %v3332_v12  ;;  %v3896_v10 = vpack.c.bf16 %v1280_v7, %v1276_v6  ;;  %v1279_v12 = vld [vmem:[#allocation3 + $0x120] sm:$0xff] }
 0x15f   :  { %3333 = vtanh.f32 %v3803_v11 }
 0x160   :  { %v755_v18 = vadd.f32 0.5, %v754_v13 }
 0x169   :  { %v3334_v21 = vpop.eup %3333 }
 0x16a   :  { %v3806_v26 = vmul.f32 %v3334_v21, %v755_v18  ;;  %v1284_v18 = vld [vmem:[#allocation3 + $0x148] sm:$0xff] }
 0x16b   :  { %v1288_v21 = vld [vmem:[#allocation3 + $0x168] sm:$0xff] }
 0x16c   :  { %898 = vmatmul.mubr.f32.vlgmr.msra.gmra.mrb[2].mxu0 %v3806_v26  ;;  %969 = vmatmul.mubr.f32.vlgmr.msra.gmra.mrb[2].mxu1 %v3806_v26 }
 0x16d   :  { %2842 = vmatpush1.bf16.msra.mxu0 %v3606_v23  ;;  %2874 = vmatpush1.bf16.msra.mxu1 %v3720_v16 }
 0x16e   :  { %2844 = vmatprep.subr.bf16.mxu0 %v3609_v24  ;;  %2876 = vmatprep.subr.bf16.mxu1 %v3723_v17 }
 0x16f   :  { %1134 = vmatprep.mubr.f32.mxu0 %v3485_v14  ;;  %1205 = vmatprep.mubr.f32.mxu1 %v3485_v14 }
 0x171   :  { %2846 = vmatpush1.bf16.msra.mxu0 %v3618_v30  ;;  %2878 = vmatpush1.bf16.msra.mxu1 %v3731_v22 }
 0x172   :  { %2848 = vmatprep.subr.bf16.mxu0 %v3621_v31  ;;  %2880 = vmatprep.subr.bf16.mxu1 %v3735_v25 }
 0x175   :  { %2850 = vmatpush1.bf16.msra.mxu0 %v3633_v37  ;;  %2882 = vmatpush1.bf16.msra.mxu1 %v3738_v32 }
 0x176   :  { %2852 = vmatprep.subr.bf16.mxu0 %v3636_v38  ;;  %2884 = vmatprep.subr.bf16.mxu1 %v3741_v15 }
 0x179   :  { %2854 = vmatpush1.bf16.msra.mxu0 %v3648_v44  ;;  %2886 = vmatpush1.bf16.msra.mxu1 %v3744_v39 }
 0x17a   :  { %2856 = vmatprep.subr.bf16.mxu0 %v3651_v45  ;;  %2888 = vmatprep.subr.bf16.mxu1 %v3747_v40 }
 0x17d   :  { %2858 = vmatpush1.bf16.msra.mxu0 %v3663_v51  ;;  %2890 = vmatpush1.bf16.msra.mxu1 %v3750_v47 }
 0x17e   :  { %2860 = vmatprep.subr.bf16.mxu0 %v3666_v52  ;;  %2892 = vmatprep.subr.bf16.mxu1 %v3753_v48 }
 0x181   :  { %2862 = vmatpush1.bf16.msra.mxu0 %v3678_v58  ;;  %2894 = vmatpush1.bf16.msra.mxu1 %v3756_v55 }
 0x182   :  { %2864 = vmatprep.subr.bf16.mxu0 %v3681_v59  ;;  %2896 = vmatprep.subr.bf16.mxu1 %v3759_v56 }
 0x185   :  { %2866 = vmatpush1.bf16.msra.mxu0 %v3693_v1  ;;  %2898 = vmatpush1.bf16.msra.mxu1 %v3762_v63 }
 0x186   :  { %2868 = vmatprep.subr.bf16.mxu0 %v3696_v2  ;;  %2900 = vmatprep.subr.bf16.mxu1 %v3765_v0 }
 0x189   :  { %2870 = vmatpush1.bf16.msra.mxu0 %v3708_v8  ;;  %2902 = vmatpush1.bf16.msra.mxu1 %v3768_v5 }
 0x18a   :  { %2936 = vmatprep.subr.bf16.mxu1 %v3711_v9 }
 0x23f   :  { %v899_v23 = vpop.f32.mrb[2].mxu0  ;;  %v970_v24 = vpop.f32.mrb[2].mxu1 }
 0x240   :  { %v3259_v30 = vadd.f32 %v899_v23, %v3791_v19  ;;  %v901_v31 = vpop.f32.mrb[3].mxu0  ;;  %v972_v37 = vpop.f32.mrb[3].mxu1  ;;  %v3275_v51 = vadd.f32 %v970_v24, %v3797_v42  ;;  %v3902_v23 = vpack.c.bf16 %v1288_v21, %v1284_v18  ;;  %v1283_v24 = vld [vmem:[#allocation3 + $0x140] sm:$0xff]  ;;  %v1482_v18 = vld [vmem:[#allocation3 + $0x10] sm:$0xff] }
 0x241   :  { %v3260_v38 = vadd.f32 %v901_v31, %v3793_v20  ;;  %v3276_v52 = vadd.f32 %v972_v37, %v3799_v43  ;;  %v1292_v37 = vld [vmem:[#allocation3 + $0x188] sm:$0xff]  ;;  %v1486_v21 = vld [vmem:[#allocation3 + $0x30] sm:$0xff] }
 0x242   :  { %v979_v44 = vmul.f32 0.5, %v3259_v30  ;;  %v1287_v30 = vld [vmem:[#allocation3 + $0x160] sm:$0xff] }
 0x243   :  { %v983_v45 = vmul.f32 0.5, %v3260_v38  ;;  %v988_v58 = vmul.f32 0.5, %v3276_v52  ;;  %v3904_v31 = vpack.c.bf16 %v1287_v30, %v1283_v24  ;;  %v1296_v38 = vld [vmem:[#allocation3 + $0x1a8] sm:$0xff]  ;;  %v3953_v24 = vpack.c.bf16 %v1486_v21, %v1482_v18  ;;  %v1491_v30 = vld [vmem:[#allocation3 + $0x58] sm:$0xff] }
 0x244   :  { %3335 = vtanh.f32 %v979_v44  ;;  %v3908_v44 = vpack.c.bf16 %v1296_v38, %v1292_v37  ;;  %v1495_v37 = vld [vmem:[#allocation3 + $0x78] sm:$0xff] }
 0x245   :  { %3337 = vtanh.f32 %v983_v45  ;;  %v1291_v45 = vld [vmem:[#allocation3 + $0x180] sm:$0xff]  ;;  %v3957_v38 = vpack.c.bf16 %v1495_v37, %v1491_v30  ;;  %v1539_v21 = vld [vmem:[#allocation3 + $0x1d8] sm:$0xff] }
 0x246   :  { %3339 = vtanh.f32 %v3275_v51  ;;  %v1295_v51 = vld [vmem:[#allocation3 + $0x1a0] sm:$0xff]  ;;  %v1543_v30 = vld [vmem:[#allocation3 + $0x1f8] sm:$0xff] }
 0x247   :  { %3341 = vtanh.f32 %v988_v58  ;;  %v3910_v52 = vpack.c.bf16 %v1295_v51, %v1291_v45  ;;  %v1300_v58 = vld [vmem:[#allocation3 + $0x1c8] sm:$0xff]  ;;  %v1490_v45 = vld [vmem:[#allocation3 + $0x50] sm:$0xff]  ;;  %v3993_v37 = vpack.c.bf16 %v1543_v30, %v1539_v21 }
 0x248   :  { %v1494_v51 = vld [vmem:[#allocation3 + $0x70] sm:$0xff] }
 0x24e   :  { %v3336_v59 = vpop.eup %3335 }
 0x24f   :  { %v3338_v1 = vpop.eup %3337  ;;  %v981_v2 = vmul.f32 0.5, %v3336_v59  ;;  %v1304_v59 = vld [vmem:[#allocation3 + $0x1e8] sm:$0xff] }
 0x250   :  { %v985_v8 = vmul.f32 0.5, %v3338_v1  ;;  %v3340_v27 = vpop.eup %3339  ;;  %v3914_v1 = vpack.c.bf16 %v1304_v59, %v1300_v58  ;;  %v3959_v58 = vpack.c.bf16 %v1494_v51, %v1490_v45  ;;  %v1499_v59 = vld [vmem:[#allocation3 + $0x98] sm:$0xff]  ;;  %v1538_v45 = vld [vmem:[#allocation3 + $0x1d0] sm:$0xff] }
 0x251   :  { %v982_v9 = vadd.f32 0.5, %v981_v2  ;;  %v3342_v35 = vpop.eup %3341  ;;  %v1299_v2 = vld [vmem:[#allocation3 + $0x1c0] sm:$0xff]  ;;  %v1542_v51 = vld [vmem:[#allocation3 + $0x1f0] sm:$0xff] }
 0x252   :  { %v986_v28 = vadd.f32 0.5, %v985_v8  ;;  %v990_v36 = vmul.f32 0.5, %v3342_v35  ;;  %v1303_v8 = vld [vmem:[#allocation3 + $0x1e0] sm:$0xff] }
 0x253   :  { %v993_v29 = vmul.f32 %v3340_v27, %v982_v9  ;;  %v3916_v9 = vpack.c.bf16 %v1303_v8, %v1299_v2  ;;  %v1503_v2 = vld [vmem:[#allocation3 + $0xb8] sm:$0xff] }
 0x254   :  { %v992_v33 = vmul.f32 %v986_v28, %v3803_v11  ;;  %v991_v41 = vadd.f32 0.5, %v990_v36  ;;  %v1275_v11 = vld [vmem:[#allocation3 + $0x100] sm:$0xff]  ;;  %v3963_v8 = vpack.c.bf16 %v1503_v2, %v1499_v59  ;;  %v3995_v59 = vpack.c.bf16 %v1542_v51, %v1538_v45 }
 0x255   :  { %v3898_v13 = vpack.c.bf16 %v1279_v12, %v1275_v11  ;;  %v1487_v11 = vld [vmem:[#allocation3 + $0x38] sm:$0xff] }
 0x256   :  { %v3848_v34 = vadd.f32 %v993_v29, %v992_v33 }
 0x258   :  { %3343 = vtanh.f32 %v3848_v34 }
 0x262   :  { %v3344_v46 = vpop.eup %3343 }
 0x263   :  { %v3851_v49 = vmul.f32 %v3344_v46, %v991_v41 }
 0x265   :  { %1135 = vmatmul.mubr.f32.vlgmr.msra.gmra.mrb[4].mxu0 %v3851_v49  ;;  %1206 = vmatmul.mubr.f32.vlgmr.msra.gmra.mrb[4].mxu1 %v3851_v49 }
 0x266   :  { %2938 = vmatpush1.bf16.msra.mxu1 %v3720_v16  ;;  %1371 = vmatprep.mubr.f32.mxu0 %v3485_v14  ;;  %v1244_v16 = vld [vmem:[#allocation3 + $0x8] sm:$0xff] }
 0x267   :  { %2940 = vmatprep.subr.bf16.mxu1 %v3723_v17  ;;  %1442 = vmatprep.mubr.f32.mxu1 %v3485_v14  ;;  %v1248_v17 = vld [vmem:[#allocation3 + $0x28] sm:$0xff] }
 0x26a   :  { %2942 = vmatpush1.bf16.msra.mxu1 %v3731_v22  ;;  %v3872_v22 = vpack.c.bf16 %v1248_v17, %v1244_v16 }
 0x26b   :  { %2944 = vmatprep.subr.bf16.mxu1 %v3735_v25  ;;  %v1243_v25 = vld [vmem:[#allocation3] sm:$0xff] }
 0x26c   :  { %2904 = vmatprep.subr.bf16.mxu0 %v3872_v22 }
 0x26e   :  { %2946 = vmatpush1.bf16.msra.mxu1 %v3738_v32  ;;  %v1247_v32 = vld [vmem:[#allocation3 + $0x20] sm:$0xff] }
 0x26f   :  { %2948 = vmatprep.subr.bf16.mxu1 %v3741_v15  ;;  %v3874_v15 = vpack.c.bf16 %v1247_v32, %v1243_v25 }
 0x271   :  { %2906 = vmatpush1.bf16.msra.mxu0 %v3874_v15 }
 0x272   :  { %2950 = vmatpush1.bf16.msra.mxu1 %v3744_v39  ;;  %v1252_v39 = vld [vmem:[#allocation3 + $0x48] sm:$0xff] }
 0x273   :  { %2952 = vmatprep.subr.bf16.mxu1 %v3747_v40  ;;  %v1256_v40 = vld [vmem:[#allocation3 + $0x68] sm:$0xff] }
 0x276   :  { %2954 = vmatpush1.bf16.msra.mxu1 %v3750_v47  ;;  %v3878_v47 = vpack.c.bf16 %v1256_v40, %v1252_v39 }
 0x277   :  { %2956 = vmatprep.subr.bf16.mxu1 %v3753_v48  ;;  %v1251_v48 = vld [vmem:[#allocation3 + $0x40] sm:$0xff] }
 0x278   :  { %2908 = vmatprep.subr.bf16.mxu0 %v3878_v47 }
 0x27a   :  { %2958 = vmatpush1.bf16.msra.mxu1 %v3756_v55  ;;  %v1255_v55 = vld [vmem:[#allocation3 + $0x60] sm:$0xff] }
 0x27b   :  { %2960 = vmatprep.subr.bf16.mxu1 %v3759_v56  ;;  %v3880_v56 = vpack.c.bf16 %v1255_v55, %v1251_v48 }
 0x27d   :  { %2910 = vmatpush1.bf16.msra.mxu0 %v3880_v56 }
 0x27e   :  { %2962 = vmatpush1.bf16.msra.mxu1 %v3762_v63  ;;  %v1260_v63 = vld [vmem:[#allocation3 + $0x88] sm:$0xff] }
 0x27f   :  { %2964 = vmatprep.subr.bf16.mxu1 %v3765_v0  ;;  %v1264_v0 = vld [vmem:[#allocation3 + $0xa8] sm:$0xff] }
 0x282   :  { %2966 = vmatpush1.bf16.msra.mxu1 %v3768_v5  ;;  %v3884_v5 = vpack.c.bf16 %v1264_v0, %v1260_v63 }
 0x284   :  { %2912 = vmatprep.subr.bf16.mxu0 %v3884_v5 }
 0x285   :  { %2914 = vmatpush1.bf16.msra.mxu0 %v3886_v54 }
 0x286   :  { %2916 = vmatprep.subr.bf16.mxu0 %v3890_v61 }
 0x289   :  { %2918 = vmatpush1.bf16.msra.mxu0 %v3892_v4 }
 0x28a   :  { %2920 = vmatprep.subr.bf16.mxu0 %v3896_v10 }
 0x28d   :  { %2922 = vmatpush1.bf16.msra.mxu0 %v3898_v13 }
 0x28e   :  { %2924 = vmatprep.subr.bf16.mxu0 %v3902_v23 }
 0x291   :  { %2926 = vmatpush1.bf16.msra.mxu0 %v3904_v31 }
 0x292   :  { %2928 = vmatprep.subr.bf16.mxu0 %v3908_v44 }
 0x295   :  { %2930 = vmatpush1.bf16.msra.mxu0 %v3910_v52 }
 0x296   :  { %2932 = vmatprep.subr.bf16.mxu0 %v3914_v1 }
 0x299   :  { %2934 = vmatpush1.bf16.msra.mxu0 %v3916_v9 }
 0x29a   :  { %2968 = vmatprep.subr.bf16.mxu0 %v3872_v22 }
 0x338   :  { %v1136_v27 = vpop.f32.mrb[4].mxu0  ;;  %v1207_v28 = vpop.f32.mrb[4].mxu1 }
 0x339   :  { %v3261_v29 = vadd.f32 %v1136_v27, %v3791_v19  ;;  %v1138_v33 = vpop.f32.mrb[5].mxu0  ;;  %v1209_v35 = vpop.f32.mrb[5].mxu1  ;;  %v3277_v16 = vadd.f32 %v1207_v28, %v3797_v42  ;;  %v1498_v27 = vld [vmem:[#allocation3 + $0x90] sm:$0xff] }
 0x33a   :  { %v3262_v36 = vadd.f32 %v1138_v33, %v3793_v20  ;;  %v3278_v17 = vadd.f32 %v1209_v35, %v3799_v43  ;;  %v1502_v28 = vld [vmem:[#allocation3 + $0xb0] sm:$0xff]  ;;  %v1507_v33 = vld [vmem:[#allocation3 + $0xd8] sm:$0xff] }
 0x33b   :  { %v1216_v41 = vmul.f32 0.5, %v3261_v29  ;;  %v3965_v29 = vpack.c.bf16 %v1502_v28, %v1498_v27  ;;  %v1511_v35 = vld [vmem:[#allocation3 + $0xf8] sm:$0xff] }
 0x33c   :  { %v1220_v46 = vmul.f32 0.5, %v3262_v36  ;;  %v1225_v25 = vmul.f32 0.5, %v3278_v17  ;;  %v3969_v36 = vpack.c.bf16 %v1511_v35, %v1507_v33  ;;  %v1515_v17 = vld [vmem:[#allocation3 + $0x118] sm:$0xff] }
 0x33d   :  { %3345 = vtanh.f32 %v1216_v41  ;;  %v1506_v41 = vld [vmem:[#allocation3 + $0xd0] sm:$0xff] }
 0x33e   :  { %3347 = vtanh.f32 %v1220_v46  ;;  %v1510_v46 = vld [vmem:[#allocation3 + $0xf0] sm:$0xff] }
 0x33f   :  { %3349 = vtanh.f32 %v3277_v16  ;;  %v3971_v16 = vpack.c.bf16 %v1510_v46, %v1506_v41 }
 0x340   :  { %3351 = vtanh.f32 %v1225_v25  ;;  %v1519_v25 = vld [vmem:[#allocation3 + $0x138] sm:$0xff] }
 0x347   :  { %v3346_v32 = vpop.eup %3345 }
 0x348   :  { %v3348_v39 = vpop.eup %3347  ;;  %v1218_v40 = vmul.f32 0.5, %v3346_v32  ;;  %v3975_v32 = vpack.c.bf16 %v1519_v25, %v1515_v17 }
 0x349   :  { %v1222_v48 = vmul.f32 0.5, %v3348_v39  ;;  %v3350_v63 = vpop.eup %3349  ;;  %v1514_v39 = vld [vmem:[#allocation3 + $0x110] sm:$0xff] }
 0x34a   :  { %v1219_v55 = vadd.f32 0.5, %v1218_v40  ;;  %v3352_v60 = vpop.eup %3351  ;;  %v1518_v40 = vld [vmem:[#allocation3 + $0x130] sm:$0xff] }
 0x34b   :  { %v1223_v0 = vadd.f32 0.5, %v1222_v48  ;;  %v1227_v62 = vmul.f32 0.5, %v3352_v60  ;;  %v3977_v48 = vpack.c.bf16 %v1518_v40, %v1514_v39 }
 0x34c   :  { %v1230_v50 = vmul.f32 %v3350_v63, %v1219_v55  ;;  %v1523_v55 = vld [vmem:[#allocation3 + $0x158] sm:$0xff] }
 0x34d   :  { %v1229_v53 = vmul.f32 %v1223_v0, %v3848_v34  ;;  %v1228_v3 = vadd.f32 0.5, %v1227_v62  ;;  %v1483_v34 = vld [vmem:[#allocation3 + $0x18] sm:$0xff] }
 0x34e   :  { %v3951_v12 = vpack.c.bf16 %v1487_v11, %v1483_v34  ;;  %v1527_v63 = vld [vmem:[#allocation3 + $0x178] sm:$0xff]  ;;  %v1530_v34 = vld [vmem:[#allocation3 + $0x190] sm:$0xff] }
 0x34f   :  { %v3926_v57 = vadd.f32 %v1230_v50, %v1229_v53  ;;  %v3981_v0 = vpack.c.bf16 %v1527_v63, %v1523_v55  ;;  %v1522_v50 = vld [vmem:[#allocation3 + $0x150] sm:$0xff]  ;;  %v1531_v62 = vld [vmem:[#allocation3 + $0x198] sm:$0xff] }
 0x350   :  { %3000 = vmatprep.subr.bf16.mxu1 %v3951_v12  ;;  %v1526_v53 = vld [vmem:[#allocation3 + $0x170] sm:$0xff] }
 0x351   :  { %3353 = vtanh.f32 %v3926_v57  ;;  %v3983_v60 = vpack.c.bf16 %v1526_v53, %v1522_v50  ;;  %v1534_v11 = vld [vmem:[#allocation3 + $0x1b0] sm:$0xff] }
 0x352   :  { %v3989_v18 = vpack.c.bf16 %v1534_v11, %v1530_v34 }
 0x35b   :  { %v3354_v6 = vpop.eup %3353 }
 0x35c   :  { %v3929_v7 = vmul.f32 %v3354_v6, %v1228_v3  ;;  %v1535_v3 = vld [vmem:[#allocation3 + $0x1b8] sm:$0xff] }
 0x35d   :  { %v3987_v6 = vpack.c.bf16 %v1535_v3, %v1531_v62 }
 0x35e   :  { %1372 = vmatmul.mubr.f32.vlgmr.msra.gmra.mrb[6].mxu0 %v3929_v7  ;;  %1443 = vmatmul.mubr.f32.vlgmr.msra.gmra.mrb[6].mxu1 %v3929_v7 }
 0x35f   :  { %2970 = vmatpush1.bf16.msra.mxu0 %v3874_v15  ;;  %1608 = vmatprep.mubr.f32.mxu0 %v3485_v14 }
 0x360   :  { %2972 = vmatprep.subr.bf16.mxu0 %v3878_v47  ;;  %1679 = vmatprep.mubr.f32.mxu1 %v3485_v14 }
 0x361   :  { %3002 = vmatpush1.bf16.msra.mxu1 %v3953_v24 }
 0x362   :  { %3004 = vmatprep.subr.bf16.mxu1 %v3957_v38 }
 0x363   :  { %2974 = vmatpush1.bf16.msra.mxu0 %v3880_v56 }
 0x364   :  { %2976 = vmatprep.subr.bf16.mxu0 %v3884_v5 }
 0x365   :  { %3006 = vmatpush1.bf16.msra.mxu1 %v3959_v58 }
 0x366   :  { %3008 = vmatprep.subr.bf16.mxu1 %v3963_v8 }
 0x367   :  { %2978 = vmatpush1.bf16.msra.mxu0 %v3886_v54 }
 0x368   :  { %2980 = vmatprep.subr.bf16.mxu0 %v3890_v61 }
 0x369   :  { %3010 = vmatpush1.bf16.msra.mxu1 %v3965_v29 }
 0x36a   :  { %3012 = vmatprep.subr.bf16.mxu1 %v3969_v36 }
 0x36b   :  { %2982 = vmatpush1.bf16.msra.mxu0 %v3892_v4 }
 0x36c   :  { %2984 = vmatprep.subr.bf16.mxu0 %v3896_v10 }
 0x36d   :  { %3014 = vmatpush1.bf16.msra.mxu1 %v3971_v16 }
 0x36e   :  { %3016 = vmatprep.subr.bf16.mxu1 %v3975_v32 }
 0x36f   :  { %2986 = vmatpush1.bf16.msra.mxu0 %v3898_v13 }
 0x370   :  { %2988 = vmatprep.subr.bf16.mxu0 %v3902_v23 }
 0x371   :  { %3018 = vmatpush1.bf16.msra.mxu1 %v3977_v48 }
 0x372   :  { %3020 = vmatprep.subr.bf16.mxu1 %v3981_v0 }
 0x373   :  { %2990 = vmatpush1.bf16.msra.mxu0 %v3904_v31 }
 0x374   :  { %2992 = vmatprep.subr.bf16.mxu0 %v3908_v44 }
 0x375   :  { %3022 = vmatpush1.bf16.msra.mxu1 %v3983_v60 }
 0x376   :  { %3024 = vmatprep.subr.bf16.mxu1 %v3987_v6 }
 0x377   :  { %2994 = vmatpush1.bf16.msra.mxu0 %v3910_v52 }
 0x378   :  { %2996 = vmatprep.subr.bf16.mxu0 %v3914_v1 }
 0x379   :  { %3026 = vmatpush1.bf16.msra.mxu1 %v3989_v18 }
 0x37a   :  { %3028 = vmatprep.subr.bf16.mxu1 %v3993_v37 }
 0x37b   :  { %2998 = vmatpush1.bf16.msra.mxu0 %v3916_v9 }
 0x37c   :  { %3032 = vmatprep.subr.bf16.mxu0 %v3872_v22 }
 0x37d   :  { %3030 = vmatpush1.bf16.msra.mxu1 %v3995_v59 }
 0x37e   :  { %3064 = vmatprep.subr.bf16.mxu1 %v3951_v12 }
 0x431   :  { %v1373_v2 = vpop.f32.mrb[6].mxu0  ;;  %v1444_v27 = vpop.f32.mrb[6].mxu1 }
 0x432   :  { %v3263_v28 = vadd.f32 %v1373_v2, %v3791_v19  ;;  %v1375_v33 = vpop.f32.mrb[7].mxu0  ;;  %v1446_v35 = vpop.f32.mrb[7].mxu1  ;;  %v3279_v25 = vadd.f32 %v1444_v27, %v3797_v42 }
 0x433   :  { %v3264_v41 = vadd.f32 %v1375_v33, %v3793_v20  ;;  %v3280_v39 = vadd.f32 %v1446_v35, %v3799_v43 }
 0x434   :  { %v1453_v46 = vmul.f32 0.5, %v3263_v28 }
 0x435   :  { %v1457_v17 = vmul.f32 0.5, %v3264_v41  ;;  %v1462_v40 = vmul.f32 0.5, %v3280_v39 }
 0x436   :  { %3355 = vtanh.f32 %v1453_v46 }
 0x437   :  { %3357 = vtanh.f32 %v1457_v17 }
 0x438   :  { %3359 = vtanh.f32 %v3279_v25 }
 0x439   :  { %3361 = vtanh.f32 %v1462_v40 }
 0x440   :  { %v3356_v55 = vpop.eup %3355 }
 0x441   :  { %v3358_v63 = vpop.eup %3357  ;;  %v1455_v50 = vmul.f32 0.5, %v3356_v55 }
 0x442   :  { %v1459_v53 = vmul.f32 0.5, %v3358_v63  ;;  %v3360_v3 = vpop.eup %3359 }
 0x443   :  { %v1456_v62 = vadd.f32 0.5, %v1455_v50  ;;  %v3362_v45 = vpop.eup %3361 }
 0x444   :  { %v1460_v34 = vadd.f32 0.5, %v1459_v53  ;;  %v1464_v51 = vmul.f32 0.5, %v3362_v45 }
 0x445   :  { %v1467_v11 = vmul.f32 %v3360_v3, %v1456_v62 }
 0x446   :  { %v1466_v21 = vmul.f32 %v1460_v34, %v3926_v57  ;;  %v1465_v2 = vadd.f32 0.5, %v1464_v51 }
 0x448   :  { %v4005_v30 = vadd.f32 %v1467_v11, %v1466_v21 }
 0x44a   :  { %3363 = vtanh.f32 %v4005_v30 }
 0x454   :  { %v3364_v27 = vpop.eup %3363 }
 0x455   :  { %v4008_v28 = vmul.f32 %v3364_v27, %v1465_v2 }
 0x457   :  { %1609 = vmatmul.mubr.f32.vlgmr.msra.gmra.mrb[8].mxu0 %v4008_v28  ;;  %1680 = vmatmul.mubr.f32.vlgmr.msra.gmra.mrb[8].mxu1 %v4008_v28 }
 0x458   :  { %3034 = vmatpush1.bf16.msra.mxu0 %v3874_v15  ;;  %3066 = vmatpush1.bf16.msra.mxu1 %v3953_v24 }
 0x459   :  { %3036 = vmatprep.subr.bf16.mxu0 %v3878_v47  ;;  %3068 = vmatprep.subr.bf16.mxu1 %v3957_v38 }
 0x45a   :  { %1845 = vmatprep.mubr.f32.mxu0 %v3485_v14  ;;  %1916 = vmatprep.mubr.f32.mxu1 %v3485_v14 }
 0x45c   :  { %3038 = vmatpush1.bf16.msra.mxu0 %v3880_v56  ;;  %3070 = vmatpush1.bf16.msra.mxu1 %v3959_v58 }
 0x45d   :  { %3040 = vmatprep.subr.bf16.mxu0 %v3884_v5  ;;  %3072 = vmatprep.subr.bf16.mxu1 %v3963_v8 }
 0x460   :  { %3042 = vmatpush1.bf16.msra.mxu0 %v3886_v54  ;;  %3074 = vmatpush1.bf16.msra.mxu1 %v3965_v29 }
 0x461   :  { %3044 = vmatprep.subr.bf16.mxu0 %v3890_v61  ;;  %3076 = vmatprep.subr.bf16.mxu1 %v3969_v36 }
 0x464   :  { %3046 = vmatpush1.bf16.msra.mxu0 %v3892_v4  ;;  %3078 = vmatpush1.bf16.msra.mxu1 %v3971_v16 }
 0x465   :  { %3048 = vmatprep.subr.bf16.mxu0 %v3896_v10  ;;  %3080 = vmatprep.subr.bf16.mxu1 %v3975_v32 }
 0x468   :  { %3050 = vmatpush1.bf16.msra.mxu0 %v3898_v13  ;;  %3082 = vmatpush1.bf16.msra.mxu1 %v3977_v48 }
 0x469   :  { %3052 = vmatprep.subr.bf16.mxu0 %v3902_v23  ;;  %3084 = vmatprep.subr.bf16.mxu1 %v3981_v0 }
 0x46c   :  { %3054 = vmatpush1.bf16.msra.mxu0 %v3904_v31  ;;  %3086 = vmatpush1.bf16.msra.mxu1 %v3983_v60 }
 0x46d   :  { %3056 = vmatprep.subr.bf16.mxu0 %v3908_v44  ;;  %3088 = vmatprep.subr.bf16.mxu1 %v3987_v6 }
 0x470   :  { %3058 = vmatpush1.bf16.msra.mxu0 %v3910_v52  ;;  %3090 = vmatpush1.bf16.msra.mxu1 %v3989_v18 }
 0x471   :  { %3060 = vmatprep.subr.bf16.mxu0 %v3914_v1  ;;  %3092 = vmatprep.subr.bf16.mxu1 %v3993_v37 }
 0x474   :  { %3062 = vmatpush1.bf16.msra.mxu0 %v3916_v9  ;;  %3094 = vmatpush1.bf16.msra.mxu1 %v3995_v59 }
 0x475   :  { %3096 = vmatprep.subr.bf16.mxu0 %v3872_v22  ;;  %3128 = vmatprep.subr.bf16.mxu1 %v3951_v12 }
 0x52a   :  { %v1610_v57 = vpop.f32.mrb[8].mxu0  ;;  %v1681_v33 = vpop.f32.mrb[8].mxu1 }
 0x52b   :  { %v3265_v35 = vadd.f32 %v1610_v57, %v3791_v19  ;;  %v1612_v41 = vpop.f32.mrb[9].mxu0  ;;  %v1683_v46 = vpop.f32.mrb[9].mxu1  ;;  %v3281_v40 = vadd.f32 %v1681_v33, %v3797_v42 }
 0x52c   :  { %v3266_v17 = vadd.f32 %v1612_v41, %v3793_v20  ;;  %v3282_v55 = vadd.f32 %v1683_v46, %v3799_v43 }
 0x52d   :  { %v1690_v25 = vmul.f32 0.5, %v3265_v35 }
 0x52e   :  { %v1694_v39 = vmul.f32 0.5, %v3266_v17  ;;  %v1699_v22 = vmul.f32 0.5, %v3282_v55 }
 0x52f   :  { %3365 = vtanh.f32 %v1690_v25 }
 0x530   :  { %3367 = vtanh.f32 %v1694_v39 }
 0x531   :  { %3369 = vtanh.f32 %v3281_v40 }
 0x532   :  { %3371 = vtanh.f32 %v1699_v22 }
 0x539   :  { %v3366_v63 = vpop.eup %3365 }
 0x53a   :  { %v3368_v50 = vpop.eup %3367  ;;  %v1692_v53 = vmul.f32 0.5, %v3366_v63 }
 0x53b   :  { %v1696_v62 = vmul.f32 0.5, %v3368_v50  ;;  %v3370_v34 = vpop.eup %3369  ;;  %v2211_v50 = vld [vmem:[#allocation3 + $0xa0] sm:$0xff] }
 0x53c   :  { %v1693_v3 = vadd.f32 0.5, %v1692_v53  ;;  %v3372_v2 = vpop.eup %3371 }
 0x53d   :  { %v1697_v11 = vadd.f32 0.5, %v1696_v62  ;;  %v1701_v27 = vmul.f32 0.5, %v3372_v2  ;;  %v2216_v62 = vld [vmem:[#allocation3 + $0xc8] sm:$0xff] }
 0x53e   :  { %v1704_v21 = vmul.f32 %v3370_v34, %v1693_v3  ;;  %v2220_v3 = vld [vmem:[#allocation3 + $0xe8] sm:$0xff] }
 0x53f   :  { %v1703_v45 = vmul.f32 %v1697_v11, %v4005_v30  ;;  %v1702_v57 = vadd.f32 0.5, %v1701_v27  ;;  %v3171_v34 = vpack.c.bf16 %v2220_v3, %v2216_v62  ;;  %v2215_v11 = vld [vmem:[#allocation3 + $0xc0] sm:$0xff]  ;;  %v2228_v2 = vld [vmem:[#allocation3 + $0x128] sm:$0xff] }
 0x541   :  { %v4051_v51 = vadd.f32 %v1704_v21, %v1703_v45  ;;  %v2219_v21 = vld [vmem:[#allocation3 + $0xe0] sm:$0xff] }
 0x542   :  { %v3173_v45 = vpack.c.bf16 %v2219_v21, %v2215_v11  ;;  %v2433_v11 = vld [vmem:[#allocation5 + $0x10] sm:$0xff]  ;;  %v2434_v21 = vld [vmem:[#allocation5 + $0x18] sm:$0xff] }
 0x543   :  { %3373 = vtanh.f32 %v4051_v51 }
 0x54d   :  { %v3374_v33 = vpop.eup %3373 }
 0x54e   :  { %v4054_v35 = vmul.f32 %v3374_v33, %v1702_v57  ;;  %v2223_v57 = vld [vmem:[#allocation3 + $0x100] sm:$0xff] }
 0x54f   :  { %v2227_v33 = vld [vmem:[#allocation3 + $0x120] sm:$0xff] }
 0x550   :  { %1846 = vmatmul.mubr.f32.vlgmr.msra.gmra.mrb[10].mxu0 %v4054_v35  ;;  %1917 = vmatmul.mubr.f32.vlgmr.msra.gmra.mrb[10].mxu1 %v4054_v35 }
 0x551   :  { %3098 = vmatpush1.bf16.msra.mxu0 %v3874_v15  ;;  %3130 = vmatpush1.bf16.msra.mxu1 %v3953_v24 }
 0x552   :  { %3100 = vmatprep.subr.bf16.mxu0 %v3878_v47  ;;  %3132 = vmatprep.subr.bf16.mxu1 %v3957_v38 }
 0x553   :  { %2082 = vmatprep.mubr.f32.mxu0 %v3485_v14  ;;  %2153 = vmatprep.mubr.f32.mxu1 %v3485_v14 }
 0x555   :  { %3102 = vmatpush1.bf16.msra.mxu0 %v3880_v56  ;;  %3134 = vmatpush1.bf16.msra.mxu1 %v3959_v58 }
 0x556   :  { %3104 = vmatprep.subr.bf16.mxu0 %v3884_v5  ;;  %3136 = vmatprep.subr.bf16.mxu1 %v3963_v8 }
 0x559   :  { %3106 = vmatpush1.bf16.msra.mxu0 %v3886_v54  ;;  %3138 = vmatpush1.bf16.msra.mxu1 %v3965_v29 }
 0x55a   :  { %3108 = vmatprep.subr.bf16.mxu0 %v3890_v61  ;;  %3140 = vmatprep.subr.bf16.mxu1 %v3969_v36 }
 0x55d   :  { %3110 = vmatpush1.bf16.msra.mxu0 %v3892_v4  ;;  %3142 = vmatpush1.bf16.msra.mxu1 %v3971_v16 }
 0x55e   :  { %3112 = vmatprep.subr.bf16.mxu0 %v3896_v10  ;;  %3144 = vmatprep.subr.bf16.mxu1 %v3975_v32 }
 0x561   :  { %3114 = vmatpush1.bf16.msra.mxu0 %v3898_v13  ;;  %3146 = vmatpush1.bf16.msra.mxu1 %v3977_v48 }
 0x562   :  { %3116 = vmatprep.subr.bf16.mxu0 %v3902_v23  ;;  %3148 = vmatprep.subr.bf16.mxu1 %v3981_v0 }
 0x565   :  { %3118 = vmatpush1.bf16.msra.mxu0 %v3904_v31  ;;  %3150 = vmatpush1.bf16.msra.mxu1 %v3983_v60 }
 0x566   :  { %3120 = vmatprep.subr.bf16.mxu0 %v3908_v44  ;;  %3152 = vmatprep.subr.bf16.mxu1 %v3987_v6 }
 0x569   :  { %3122 = vmatpush1.bf16.msra.mxu0 %v3910_v52  ;;  %3154 = vmatpush1.bf16.msra.mxu1 %v3989_v18 }
 0x56a   :  { %3124 = vmatprep.subr.bf16.mxu0 %v3914_v1  ;;  %3156 = vmatprep.subr.bf16.mxu1 %v3993_v37 }
 0x56d   :  { %3126 = vmatpush1.bf16.msra.mxu0 %v3916_v9  ;;  %3158 = vmatpush1.bf16.msra.mxu1 %v3995_v59 }
 0x56e   :  { %3192 = vmatprep.subr.bf16.mxu1 %v3951_v12 }
 0x623   :  { %v1847_v15 = vpop.f32.mrb[10].mxu0  ;;  %v1918_v47 = vpop.f32.mrb[10].mxu1 }
 0x624   :  { %v3267_v56 = vadd.f32 %v1847_v15, %v3791_v19  ;;  %v1849_v5 = vpop.f32.mrb[11].mxu0  ;;  %v1920_v54 = vpop.f32.mrb[11].mxu1  ;;  %v3283_v13 = vadd.f32 %v1918_v47, %v3797_v42  ;;  %v3177_v15 = vpack.c.bf16 %v2227_v33, %v2223_v57  ;;  %v2232_v47 = vld [vmem:[#allocation3 + $0x148] sm:$0xff] }
 0x625   :  { %v3268_v61 = vadd.f32 %v1849_v5, %v3793_v20  ;;  %v3284_v23 = vadd.f32 %v1920_v54, %v3799_v43  ;;  %v2231_v54 = vld [vmem:[#allocation3 + $0x140] sm:$0xff]  ;;  %v2436_v33 = vld [vmem:[#allocation5 + $0x28] sm:$0xff] }
 0x626   :  { %v1927_v4 = vmul.f32 0.5, %v3267_v56  ;;  %v2236_v56 = vld [vmem:[#allocation3 + $0x168] sm:$0xff] }
 0x627   :  { %v1931_v10 = vmul.f32 0.5, %v3268_v61  ;;  %v1936_v31 = vmul.f32 0.5, %v3284_v23  ;;  %v3179_v5 = vpack.c.bf16 %v2236_v56, %v2232_v47  ;;  %v2235_v61 = vld [vmem:[#allocation3 + $0x160] sm:$0xff] }
 0x628   :  { %3375 = vtanh.f32 %v1927_v4  ;;  %v3181_v4 = vpack.c.bf16 %v2235_v61, %v2231_v54  ;;  %v2435_v57 = vld [vmem:[#allocation5 + $0x20] sm:$0xff]  ;;  %v2438_v47 = vld [vmem:[#allocation5 + $0x38] sm:$0xff]  ;;  %v2440_v54 = vld [vmem:[#allocation5 + $0x48] sm:$0xff] }
 0x629   :  { %3377 = vtanh.f32 %v1931_v10  ;;  %v2240_v10 = vld [vmem:[#allocation3 + $0x188] sm:$0xff] }
 0x62a   :  { %3379 = vtanh.f32 %v3283_v13  ;;  %v2244_v13 = vld [vmem:[#allocation3 + $0x1a8] sm:$0xff] }
 0x62b   :  { %3381 = vtanh.f32 %v1936_v31  ;;  %v3183_v23 = vpack.c.bf16 %v2244_v13, %v2240_v10  ;;  %v2239_v31 = vld [vmem:[#allocation3 + $0x180] sm:$0xff] }
 0x62c   :  { %v2442_v10 = vld [vmem:[#allocation5 + $0x58] sm:$0xff] }
 0x632   :  { %v3376_v44 = vpop.eup %3375 }
 0x633   :  { %v3378_v52 = vpop.eup %3377  ;;  %v1929_v1 = vmul.f32 0.5, %v3376_v44  ;;  %v2243_v44 = vld [vmem:[#allocation3 + $0x1a0] sm:$0xff] }
 0x634   :  { %v1933_v9 = vmul.f32 0.5, %v3378_v52  ;;  %v3380_v30 = vpop.eup %3379  ;;  %v3185_v52 = vpack.c.bf16 %v2243_v44, %v2239_v31  ;;  %v2444_v31 = vld [vmem:[#allocation5 + $0x68] sm:$0xff]  ;;  %v2445_v44 = vld [vmem:[#allocation5 + $0x70] sm:$0xff] }
 0x635   :  { %v1930_v12 = vadd.f32 0.5, %v1929_v1  ;;  %v3382_v39 = vpop.eup %3381  ;;  %v2248_v1 = vld [vmem:[#allocation3 + $0x1c8] sm:$0xff] }
 0x636   :  { %v1934_v41 = vadd.f32 0.5, %v1933_v9  ;;  %v1938_v40 = vmul.f32 0.5, %v3382_v39  ;;  %v2252_v9 = vld [vmem:[#allocation3 + $0x1e8] sm:$0xff] }
 0x637   :  { %v1941_v46 = vmul.f32 %v3380_v30, %v1930_v12  ;;  %v3187_v12 = vpack.c.bf16 %v2252_v9, %v2248_v1  ;;  %v2247_v30 = vld [vmem:[#allocation3 + $0x1c0] sm:$0xff]  ;;  %v2432_v39 = vld [vmem:[#allocation5 + $0x8] sm:$0xff] }
 0x638   :  { %v1940_v17 = vmul.f32 %v1934_v41, %v4051_v51  ;;  %v1939_v55 = vadd.f32 0.5, %v1938_v40  ;;  %v2224_v51 = vld [vmem:[#allocation3 + $0x108] sm:$0xff]  ;;  %v2251_v41 = vld [vmem:[#allocation3 + $0x1e0] sm:$0xff] }
 0x639   :  { %v3175_v27 = vpack.c.bf16 %v2228_v2, %v2224_v51 }
 0x63a   :  { %v4096_v25 = vadd.f32 %v1941_v46, %v1940_v17  ;;  %v3189_v46 = vpack.c.bf16 %v2251_v41, %v2247_v30  ;;  %v2431_v17 = vld [vmem:[#allocation5] sm:$0xff] }
 0x63b   :  { %v3223_v40 = vpack.c.bf16 %v2432_v39, %v2431_v17 }
 0x63c   :  { %3383 = vtanh.f32 %v4096_v25 }
 0x646   :  { %v3384_v22 = vpop.eup %3383 }
 0x647   :  { %v4099_v63 = vmul.f32 %v3384_v22, %v1939_v55 }
 0x649   :  { %2083 = vmatmul.mubr.f32.vlgmr.msra.gmra.mrb[12].mxu0 %v4099_v63  ;;  %2154 = vmatmul.mubr.f32.vlgmr.msra.gmra.mrb[12].mxu1 %v4099_v63 }
 0x64a   :  { %3194 = vmatpush1.bf16.msra.mxu1 %v3953_v24  ;;  %2319 = vmatprep.mubr.f32.mxu0 %v3485_v14  ;;  %v2196_v24 = vld [vmem:[#allocation3 + $0x28] sm:$0xff] }
 0x64b   :  { %3196 = vmatprep.subr.bf16.mxu1 %v3957_v38  ;;  %2390 = vmatprep.mubr.f32.mxu1 %v3485_v14  ;;  %v2192_v14 = vld [vmem:[#allocation3 + $0x8] sm:$0xff] }
 0x64c   :  { %v3159_v38 = vpack.c.bf16 %v2196_v24, %v2192_v14 }
 0x64e   :  { %3198 = vmatpush1.bf16.msra.mxu1 %v3959_v58  ;;  %v2191_v58 = vld [vmem:[#allocation3] sm:$0xff]  ;;  %3160 = vmatprep.subr.bf16.mxu0 %v3159_v38 }
 0x64f   :  { %3200 = vmatprep.subr.bf16.mxu1 %v3963_v8  ;;  %v2195_v8 = vld [vmem:[#allocation3 + $0x20] sm:$0xff] }
 0x652   :  { %3202 = vmatpush1.bf16.msra.mxu1 %v3965_v29  ;;  %v3161_v29 = vpack.c.bf16 %v2195_v8, %v2191_v58 }
 0x653   :  { %3204 = vmatprep.subr.bf16.mxu1 %v3969_v36  ;;  %v2200_v36 = vld [vmem:[#allocation3 + $0x48] sm:$0xff] }
 0x654   :  { %3162 = vmatpush1.bf16.msra.mxu0 %v3161_v29 }
 0x656   :  { %3206 = vmatpush1.bf16.msra.mxu1 %v3971_v16  ;;  %v2204_v16 = vld [vmem:[#allocation3 + $0x68] sm:$0xff] }
 0x657   :  { %3208 = vmatprep.subr.bf16.mxu1 %v3975_v32  ;;  %v3163_v32 = vpack.c.bf16 %v2204_v16, %v2200_v36 }
 0x659   :  { %3164 = vmatprep.subr.bf16.mxu0 %v3163_v32 }
 0x65a   :  { %3210 = vmatpush1.bf16.msra.mxu1 %v3977_v48  ;;  %v2199_v48 = vld [vmem:[#allocation3 + $0x40] sm:$0xff] }
 0x65b   :  { %3212 = vmatprep.subr.bf16.mxu1 %v3981_v0  ;;  %v2203_v0 = vld [vmem:[#allocation3 + $0x60] sm:$0xff] }
 0x65e   :  { %3214 = vmatpush1.bf16.msra.mxu1 %v3983_v60  ;;  %v3165_v60 = vpack.c.bf16 %v2203_v0, %v2199_v48 }
 0x65f   :  { %3216 = vmatprep.subr.bf16.mxu1 %v3987_v6  ;;  %v2208_v6 = vld [vmem:[#allocation3 + $0x88] sm:$0xff] }
 0x660   :  { %3166 = vmatpush1.bf16.msra.mxu0 %v3165_v60 }
 0x662   :  { %3218 = vmatpush1.bf16.msra.mxu1 %v3989_v18  ;;  %v2212_v18 = vld [vmem:[#allocation3 + $0xa8] sm:$0xff] }
 0x663   :  { %3220 = vmatprep.subr.bf16.mxu1 %v3993_v37  ;;  %v3167_v37 = vpack.c.bf16 %v2212_v18, %v2208_v6 }
 0x665   :  { %3168 = vmatprep.subr.bf16.mxu0 %v3167_v37 }
 0x666   :  { %3222 = vmatpush1.bf16.msra.mxu1 %v3995_v59  ;;  %v2207_v59 = vld [vmem:[#allocation3 + $0x80] sm:$0xff] }
 0x667   :  { %v3169_v53 = vpack.c.bf16 %v2211_v50, %v2207_v59 }
 0x669   :  { %3170 = vmatpush1.bf16.msra.mxu0 %v3169_v53 }
 0x66a   :  { %3172 = vmatprep.subr.bf16.mxu0 %v3171_v34 }
 0x66d   :  { %3174 = vmatpush1.bf16.msra.mxu0 %v3173_v45 }
 0x66e   :  { %3176 = vmatprep.subr.bf16.mxu0 %v3175_v27  ;;  %v3227_v27 = vpack.c.bf16 %v2434_v21, %v2433_v11 }
 0x671   :  { %3178 = vmatpush1.bf16.msra.mxu0 %v3177_v15  ;;  %v2437_v15 = vld [vmem:[#allocation5 + $0x30] sm:$0xff] }
 0x672   :  { %3180 = vmatprep.subr.bf16.mxu0 %v3179_v5  ;;  %v3235_v56 = vpack.c.bf16 %v2438_v47, %v2437_v15  ;;  %v2439_v5 = vld [vmem:[#allocation5 + $0x40] sm:$0xff] }
 0x673   :  { %v3239_v61 = vpack.c.bf16 %v2440_v54, %v2439_v5 }
 0x675   :  { %3182 = vmatpush1.bf16.msra.mxu0 %v3181_v4  ;;  %v2441_v4 = vld [vmem:[#allocation5 + $0x50] sm:$0xff] }
 0x676   :  { %3184 = vmatprep.subr.bf16.mxu0 %v3183_v23  ;;  %v3243_v13 = vpack.c.bf16 %v2442_v10, %v2441_v4  ;;  %v2443_v23 = vld [vmem:[#allocation5 + $0x60] sm:$0xff] }
 0x679   :  { %3186 = vmatpush1.bf16.msra.mxu0 %v3185_v52  ;;  %v2446_v52 = vld [vmem:[#allocation5 + $0x78] sm:$0xff] }
 0x67a   :  { %3188 = vmatprep.subr.bf16.mxu0 %v3187_v12  ;;  %v3251_v1 = vpack.c.bf16 %v2446_v52, %v2445_v44 }
 0x67d   :  { %3190 = vmatpush1.bf16.msra.mxu0 %v3189_v46 }
 0x67e   :  { %3224 = vmatprep.subr.bf16.mxu0 %v3223_v40 }
 0x71c   :  { %v2084_v55 = vpop.f32.mrb[12].mxu0  ;;  %v2155_v22 = vpop.f32.mrb[12].mxu1 }
 0x71d   :  { %v3269_v14 = vadd.f32 %v2084_v55, %v3791_v19  ;;  %v2086_v24 = vpop.f32.mrb[13].mxu0  ;;  %v2157_v38 = vpop.f32.mrb[13].mxu1  ;;  %v3285_v36 = vadd.f32 %v2155_v22, %v3797_v42 }
 0x71e   :  { %v3270_v58 = vadd.f32 %v2086_v24, %v3793_v20  ;;  %v3286_v16 = vadd.f32 %v2157_v38, %v3799_v43 }
 0x71f   :  { %v2164_v8 = vmul.f32 0.5, %v3269_v14 }
 0x720   :  { %v2168_v29 = vmul.f32 0.5, %v3270_v58  ;;  %v2173_v32 = vmul.f32 0.5, %v3286_v16 }
 0x721   :  { %3385 = vtanh.f32 %v2164_v8 }
 0x722   :  { %3387 = vtanh.f32 %v2168_v29  ;;  %v2634_v29 = vld [vmem:[#allocation6] ss:$0 sm:$0xff] }
 0x723   :  { %3389 = vtanh.f32 %v3285_v36 }
 0x724   :  { %3391 = vtanh.f32 %v2173_v32 }
 0x72b   :  { %v3386_v48 = vpop.eup %3385 }
 0x72c   :  { %v3388_v0 = vpop.eup %3387  ;;  %v2166_v60 = vmul.f32 0.5, %v3386_v48 }
 0x72d   :  { %v2170_v6 = vmul.f32 0.5, %v3388_v0  ;;  %v3390_v37 = vpop.eup %3389 }
 0x72e   :  { %v2167_v18 = vadd.f32 0.5, %v2166_v60  ;;  %v3392_v3 = vpop.eup %3391 }
 0x72f   :  { %v2171_v59 = vadd.f32 0.5, %v2170_v6  ;;  %v2175_v34 = vmul.f32 0.5, %v3392_v3 }
 0x730   :  { %v2178_v50 = vmul.f32 %v3390_v37, %v2167_v18 }
 0x731   :  { %v2177_v53 = vmul.f32 %v2171_v59, %v4096_v25  ;;  %v2176_v45 = vadd.f32 0.5, %v2175_v34  ;;  %v3231_v25 = vpack.c.bf16 %v2436_v33, %v2435_v57 }
 0x733   :  { %v4125_v62 = vadd.f32 %v2178_v50, %v2177_v53 }
 0x735   :  { %3393 = vtanh.f32 %v4125_v62 }
 0x73f   :  { %v3394_v51 = vpop.eup %3393 }
 0x740   :  { %v2181_v2 = vmul.f32 %v3394_v51, %v2176_v45 }
 0x742   :  { %2320 = vmatmul.mubr.f32.vlgmr.msra.gmra.mrb[14].mxu0 %v2181_v2  ;;  %2391 = vmatmul.mubr.f32.vlgmr.msra.gmra.mrb[14].mxu1 %v2181_v2 }
 0x743   :  { %3226 = vmatpush3.bf16.msra.mxu0 %v3223_v40  ;;  %2691 = vmatprep.mubr.f32.mxu0 %v3806_v26  ;;  %v3247_v26 = vpack.c.bf16 %v2444_v31, %v2443_v23 }
 0x744   :  { %3228 = vmatprep.subr.bf16.mxu0 %v3227_v27 }
 0x747   :  { %3230 = vmatpush3.bf16.msra.mxu0 %v3227_v27 }
 0x748   :  { %3232 = vmatprep.subr.bf16.mxu0 %v3231_v25 }
 0x74b   :  { %3234 = vmatpush3.bf16.msra.mxu0 %v3231_v25 }
 0x74c   :  { %3236 = vmatprep.subr.bf16.mxu0 %v3235_v56 }
 0x74f   :  { %3238 = vmatpush3.bf16.msra.mxu0 %v3235_v56 }
 0x750   :  { %3240 = vmatprep.subr.bf16.mxu0 %v3239_v61 }
 0x753   :  { %3242 = vmatpush3.bf16.msra.mxu0 %v3239_v61 }
 0x754   :  { %3244 = vmatprep.subr.bf16.mxu0 %v3243_v13 }
 0x757   :  { %3246 = vmatpush3.bf16.msra.mxu0 %v3243_v13 }
 0x758   :  { %3248 = vmatprep.subr.bf16.mxu0 %v3247_v26 }
 0x75b   :  { %3250 = vmatpush3.bf16.msra.mxu0 %v3247_v26 }
 0x75c   :  { %3252 = vmatprep.subr.bf16.mxu0 %v3251_v1 }
 0x75f   :  { %3254 = vmatpush3.bf16.msra.mxu0 %v3251_v1 }
 0x762   :  { %2692 = vmatmul.mubr.f32.vlgmr.msra.gmra.mrb[16].mxu0 %v3851_v49 }
 0x763   :  { %2694 = vmatprep.mubr.f32.mxu0 %v3929_v7 }
 0x766   :  { %2695 = vmatmul.mubr.f32.gmra.mrb[18].mxu0 %v4008_v28 }
 0x767   :  { %2697 = vmatprep.mubr.f32.mxu0 %v4054_v35 }
 0x76a   :  { %2698 = vmatmul.mubr.f32.gmra.mrb[20].mxu0 %v4099_v63 }
 0x76b   :  { %2700 = vmatprep.mubr.f32.mxu0 %v2181_v2 }
 0x815   :  { %v2321_v9 = vpop.f32.mrb[14].mxu0  ;;  %v2392_v12 = vpop.f32.mrb[14].mxu1 }
 0x816   :  { %v3271_v30 = vadd.f32 %v2321_v9, %v3791_v19  ;;  %v2323_v41 = vpop.f32.mrb[15].mxu0  ;;  %v2394_v46 = vpop.f32.mrb[15].mxu1  ;;  %v3287_v49 = vadd.f32 %v2392_v12, %v3797_v42 }
 0x817   :  { %v3272_v17 = vadd.f32 %v2323_v41, %v3793_v20  ;;  %v3288_v7 = vadd.f32 %v2394_v46, %v3799_v43 }
 0x818   :  { %v2401_v39 = vmul.f32 0.5, %v3271_v30 }
 0x819   :  { %v2405_v40 = vmul.f32 0.5, %v3272_v17  ;;  %v2410_v28 = vmul.f32 0.5, %v3288_v7 }
 0x81a   :  { %3395 = vtanh.f32 %v2401_v39 }
 0x81b   :  { %3397 = vtanh.f32 %v2405_v40 }
 0x81c   :  { %3399 = vtanh.f32 %v3287_v49 }
 0x81d   :  { %3401 = vtanh.f32 %v2410_v28 }
 0x824   :  { %v3396_v35 = vpop.eup %3395 }
 0x825   :  { %v3398_v63 = vpop.eup %3397  ;;  %v2403_v55 = vmul.f32 0.5, %v3396_v35 }
 0x826   :  { %v2407_v22 = vmul.f32 0.5, %v3398_v63  ;;  %v3400_v14 = vpop.eup %3399 }
 0x827   :  { %v2404_v19 = vadd.f32 0.5, %v2403_v55  ;;  %v3402_v8 = vpop.eup %3401 }
 0x828   :  { %v2408_v24 = vadd.f32 0.5, %v2407_v22  ;;  %v2412_v42 = vmul.f32 0.5, %v3402_v8 }
 0x829   :  { %v2415_v38 = vmul.f32 %v3400_v14, %v2404_v19 }
 0x82a   :  { %v2414_v20 = vmul.f32 %v2408_v24, %v4125_v62  ;;  %v2413_v32 = vadd.f32 0.5, %v2412_v42 }
 0x82c   :  { %v2416_v58 = vadd.f32 %v2415_v38, %v2414_v20 }
 0x82e   :  { %3403 = vtanh.f32 %v2416_v58 }
 0x835   :  { %v2693_v36 = vpop.f32.mrb[16].mxu0 }
 0x836   :  { %v2526_v16 = vadd.f32 %v2693_v36, %v2634_v29  ;;  %v2520_v43 = vpop.f32.mrb[17].mxu0 }
 0x837   :  { %v2521_v48 = vadd.f32 %v2634_v29, %v2520_v43 }
 0x838   :  { %v3404_v0 = vpop.eup %3403  ;;  %2560 = vst [vmem:[#allocation11 + $0x8] sm:$0xff] %v2526_v16 }
 0x839   :  { %2559 = vst [vmem:[#allocation11] sm:$0xff] %v2521_v48  ;;  %v2696_v60 = vpop.f32.mrb[18].mxu0  ;;  %v2418_v6 = vmul.f32 %v3404_v0, %v2413_v32 }
 0x83a   :  { %v2536_v18 = vadd.f32 %v2696_v60, %v2634_v29  ;;  %v2530_v37 = vpop.f32.mrb[19].mxu0 }
 0x83b   :  { %v2531_v59 = vadd.f32 %v2634_v29, %v2530_v37  ;;  %2701 = vmatmul.mubr.f32.gmra.mrb[22].mxu0 %v2418_v6 }
 0x83c   :  { %2562 = vst [vmem:[#allocation11 + $0x18] sm:$0xff] %v2536_v18 }
 0x83d   :  { %2561 = vst [vmem:[#allocation11 + $0x10] sm:$0xff] %v2531_v59  ;;  %v2699_v50 = vpop.f32.mrb[20].mxu0 }
 0x83e   :  { %v2546_v53 = vadd.f32 %v2699_v50, %v2634_v29  ;;  %v2540_v62 = vpop.f32.mrb[21].mxu0 }
 0x83f   :  { %v2541_v3 = vadd.f32 %v2634_v29, %v2540_v62 }
 0x840   :  { %2564 = vst [vmem:[#allocation11 + $0x28] sm:$0xff] %v2546_v53 }
 0x841   :  { %2563 = vst [vmem:[#allocation11 + $0x20] sm:$0xff] %v2541_v3 }
 0x90e   :  { %v2702_v34 = vpop.f32.mrb[22].mxu0 }
 0x90f   :  { %v2556_v11 = vadd.f32 %v2702_v34, %v2634_v29  ;;  %v2550_v21 = vpop.f32.mrb[23].mxu0 }
 0x910   :  { %v2551_v45 = vadd.f32 %v2634_v29, %v2550_v21 }
 0x911   :  { %2566 = vst [vmem:[#allocation11 + $0x38] sm:$0xff] %v2556_v11 }
 0x912   :  { %2565 = vst [vmem:[#allocation11 + $0x30] sm:$0xff] %v2551_v45 }
 0x913   :  { %3460 = shalt.err (!%p3457_p6)
}
 0x914   :  { %s3461_s7 = scalar_lea.hbm %s4157_s6, 1024 }
 0x915   :  { %p3462_p7 = scmp.ne.s32.totalorder %s4157_s6, %s3461_s7  ;;  %p3465_p8 = scmp.lt.u32.totalorder %s3461_s7, %s4157_s6 }
 0x917   :  { %p3467_p9 = pnand %p3465_p8, %p3462_p7 }
 0x919   :  { %3470 = shalt.err (!%p3467_p9)
}
 0x91a   :  { %s3487_s10 = smov 128   ;;  %s3488_s11 = smov 8  }
 0x91b   :  { %2578 = dma.vmem_to_hbm [thread:$0]  %s2573_s27, 1024, %s4157_s6, [#allocation12], %s3487_s10, %s3487_s10, %s3488_s11  }
 0x91c   :  { %3481 = dma.done.wait [#allocation12], 1024  }
 0x91d   :  { %3482 = vsyncadd [#allocation12], 4294966272 }
 0x91e   :  { %2582 = vsyncpa [#allocation12], 1 }

</bundles_post_ra>
